<compile_context>
chip_gen: v7x
topology: tpu7x:2x2x1
jax: 0.10.0
libtpu: 0.0.40
codegen_flags: <defaults>
</compile_context>

<pallas_src>
import functools

import jax
import jax.numpy as jnp
from jax.experimental import pallas as pl
from jax.experimental.pallas import tpu as pltpu


def _round_up(x, m):
    return (x + m - 1) // m * m


def _make_lstm_fc_kernel(num_layers, T, B, H):
    """Builds the Pallas kernel. B is the sublane-padded batch, H the hidden size."""
    G = 4 * H

    def kernel(*args):
        # args = x, (w_ih, w_hh, bias) * num_layers, fc_w, fc_b, out, seq_scratch, gates_scratch
        x_ref = args[0]                               # (T*B, input_size)
        layer_refs = args[1:1 + 3 * num_layers]
        fc_w_ref = args[1 + 3 * num_layers]           # (H, out_pad)
        fc_b_ref = args[2 + 3 * num_layers]           # (1, out_pad)
        out_ref = args[3 + 3 * num_layers]            # (B, out_pad)
        seq_ref = args[4 + 3 * num_layers]            # (T*B, H)  scratch: layer outputs
        gates_ref = args[5 + 3 * num_layers]          # (T*B, 4H) scratch: hoisted input proj

        # Lane mask selecting the "g" (cell-candidate) gate block; hoisted out of all
        # loops so tanh/sigmoid each run once per step on a dense full-width vreg.
        lane = jax.lax.broadcasted_iota(jnp.int32, (B, G), 1)
        g_mask = (lane >= 2 * H) & (lane < 3 * H)

        h_last = jnp.zeros((B, H), jnp.float32)

        for layer in range(num_layers):               # static Python loop (small)
            w_ih = layer_refs[3 * layer][...]         # (in_dim, 4H)
            w_hh = layer_refs[3 * layer + 1][...]     # (H, 4H)
            bias = layer_refs[3 * layer + 2][...]     # (1, 4H) = b_ih + b_hh (pre-folded)

            # Hoisted input projection: one batched MXU matmul + one bias broadcast,
            # done per layer OUTSIDE the serial time loop.
            inp = x_ref[...] if layer == 0 else seq_ref[...]
            gates_ref[...] = (
                jnp.dot(inp, w_ih, preferred_element_type=jnp.float32) + bias
            )

            write_seq = layer < num_layers - 1        # last layer's per-step h is unused

            def step(t, carry, w_hh=w_hh, write_seq=write_seq):
                h, c = carry
                r = pl.multiple_of(t * B, 8)          # sublane-aligned row offset
                gates = gates_ref[pl.ds(r, B), :] + jnp.dot(
                    h, w_hh, preferred_element_type=jnp.float32)          # (B, 4H)
                # Full-vreg nonlinearities (PyTorch gate order i, f, g, o).
                act = jnp.where(g_mask, jnp.tanh(gates), jax.nn.sigmoid(gates))
                i_a = act[:, 0 * H:1 * H]
                f_a = act[:, 1 * H:2 * H]
                g_a = act[:, 2 * H:3 * H]
                o_a = act[:, 3 * H:4 * H]
                c_new = f_a * c + i_a * g_a
                h_new = o_a * jnp.tanh(c_new)
                if write_seq:
                    seq_ref[pl.ds(r, B), :] = h_new   # feed the next layer
                return h_new, c_new

            h0 = jnp.zeros((B, H), jnp.float32)
            c0 = jnp.zeros((B, H), jnp.float32)
            h_last, _ = jax.lax.fori_loop(0, T, step, (h0, c0), unroll=True)

        # Linear head on the top layer's last hidden state; output lanes padded to 128
        # so the final store is lane-dense.
        out_ref[...] = (
            jnp.dot(h_last, fc_w_ref[...], preferred_element_type=jnp.float32)
            + fc_b_ref[...]
        )

    return kernel


def init_params(key, input_size, hidden_size, num_layers, output_size):
    """Deterministic init mimicking PyTorch's U(-1/sqrt(H), 1/sqrt(H)) default (PyTorch layout)."""
    bound = 1.0 / jnp.sqrt(jnp.float32(hidden_size))
    params = {"layers": []}
    for layer in range(num_layers):
        in_dim = input_size if layer == 0 else hidden_size
        key, k1, k2, k3, k4 = jax.random.split(key, 5)
        params["layers"].append(dict(
            w_ih=jax.random.uniform(k1, (4 * hidden_size, in_dim), jnp.float32, -bound, bound),
            w_hh=jax.random.uniform(k2, (4 * hidden_size, hidden_size), jnp.float32, -bound, bound),
            b_ih=jax.random.uniform(k3, (4 * hidden_size,), jnp.float32, -bound, bound),
            b_hh=jax.random.uniform(k4, (4 * hidden_size,), jnp.float32, -bound, bound),
        ))
    key, k5, k6 = jax.random.split(key, 3)
    params["fc_w"] = jax.random.uniform(k5, (output_size, hidden_size), jnp.float32, -bound, bound)
    params["fc_b"] = jax.random.uniform(k6, (output_size,), jnp.float32, -bound, bound)
    return params


def prepare_kernel_params(params, hidden_size, output_size):
    """One-time repack into kernel layout: transposed weights, folded biases,
    lane-padded FC head (avoids per-call transposes and masked partial output stores)."""
    H = hidden_size
    out_pad = _round_up(output_size, 128)
    prepped = []
    for lp in params["layers"]:
        prepped.append(jnp.transpose(lp["w_ih"]).astype(jnp.float32))            # (in_dim, 4H)
        prepped.append(jnp.transpose(lp["w_hh"]).astype(jnp.float32))            # (H, 4H)
        prepped.append((lp["b_ih"] + lp["b_hh"]).astype(jnp.float32).reshape(1, 4 * H))
    fc_w = jnp.transpose(params["fc_w"]).astype(jnp.float32)                     # (H, out)
    fc_w = jnp.pad(fc_w, ((0, 0), (0, out_pad - output_size)))
    fc_b = jnp.pad(params["fc_b"].astype(jnp.float32), (0, out_pad - output_size))
    prepped.append(fc_w)
    prepped.append(fc_b.reshape(1, out_pad))
    return tuple(prepped)


@functools.partial(jax.jit, static_argnames=("hidden_size", "num_layers", "output_size"))
def rnn_classifier_forward(x, kernel_params, *, hidden_size, num_layers, output_size):
    B, T, in_size = x.shape
    H = hidden_size
    B_pad = _round_up(B, 8)                   # 8-sublane width: full vreg occupancy
    out_pad = _round_up(output_size, 128)     # lane-dense output store

    # Time-major, batch padded with zero rows, flattened so each layer's input
    # projection is a single (T*B_pad, K) x (K, 4H) matmul inside the kernel.
    x_tm = jnp.transpose(x, (1, 0, 2)).astype(jnp.float32)       # (T, B, in)
    x_tm = jnp.pad(x_tm, ((0, 0), (0, B_pad - B), (0, 0)))       # (T, B_pad, in)
    x2d = x_tm.reshape(T * B_pad, in_size)

    vmem = pl.BlockSpec(memory_space=pltpu.MemorySpace.VMEM)
    kernel_inputs = (x2d,) + tuple(kernel_params)

    # NOTE: at production sizes (large T*B*H), x and the seq/gates scratches should move
    # to HBM (BlockSpec(memory_space=pl.ANY)) with time-chunked double-buffered DMA, and
    # batch should be split over a "parallel" grid axis to use both v7x TensorCores.
    # At these test shapes everything comfortably fits in VMEM on v5e/v6e/v7x.
    out = pl.pallas_call(
        _make_lstm_fc_kernel(num_layers, T, B_pad, H),
        out_shape=jax.ShapeDtypeStruct((B_pad, out_pad), jnp.float32),
        in_specs=[vmem] * len(kernel_inputs),
        out_specs=vmem,
        scratch_shapes=[
            pltpu.VMEM((T * B_pad, H), jnp.float32),        # per-layer hidden sequence
            pltpu.VMEM((T * B_pad, 4 * H), jnp.float32),    # hoisted input projections
        ],
        compiler_params=pltpu.CompilerParams(
            vmem_limit_bytes=32 * 1024 * 1024,
        ),
    )(*kernel_inputs)
    return out[:B, :output_size]


def _reference_forward(x, params, hidden_size, num_layers):
    """Pure-JAX reference for correctness checking (PyTorch-equivalent math)."""
    B, T, _ = x.shape
    H = hidden_size
    layer_in = x.astype(jnp.float32)
    for lp in params["layers"]:
        w_ih, w_hh = lp["w_ih"], lp["w_hh"]
        b = lp["b_ih"] + lp["b_hh"]
        h = jnp.zeros((B, H), jnp.float32)
        c = jnp.zeros((B, H), jnp.float32)
        outs = []
        for t in range(T):
            gates = layer_in[:, t, :] @ w_ih.T + h @ w_hh.T + b
            i_g = jax.nn.sigmoid(gates[:, 0 * H:1 * H])
            f_g = jax.nn.sigmoid(gates[:, 1 * H:2 * H])
            g_g = jnp.tanh(gates[:, 2 * H:3 * H])
            o_g = jax.nn.sigmoid(gates[:, 3 * H:4 * H])
            c = f_g * c + i_g * g_g
            h = o_g * jnp.tanh(c)
            outs.append(h)
        layer_in = jnp.stack(outs, axis=1)
    return layer_in[:, -1, :] @ params["fc_w"].T + params["fc_b"]


if __name__ == "__main__":
    # Small shapes consistent with the module's forward: x is (batch, seq, input_size).
    B, T = 4, 8
    INPUT_SIZE, HIDDEN_SIZE, NUM_LAYERS, OUTPUT_SIZE = 16, 32, 2, 10

    key = jax.random.PRNGKey(0)
    key, xk, pk = jax.random.split(key, 3)
    x = jax.random.normal(xk, (B, T, INPUT_SIZE), jnp.float32)
    params = init_params(pk, INPUT_SIZE, HIDDEN_SIZE, NUM_LAYERS, OUTPUT_SIZE)
    kparams = prepare_kernel_params(params, HIDDEN_SIZE, OUTPUT_SIZE)

    out = rnn_classifier_forward(
        x, kparams,
        hidden_size=HIDDEN_SIZE, num_layers=NUM_LAYERS, output_size=OUTPUT_SIZE,
    )
    out = jax.block_until_ready(out)

    ref = _reference_forward(x, params, HIDDEN_SIZE, NUM_LAYERS)
    assert out.shape == (B, OUTPUT_SIZE)
    assert jnp.allclose(out, ref, atol=1e-4, rtol=1e-4), "kernel does not match reference"

    print("KERNEL_OK")
</pallas_src>

<mosaic_0001>
module attributes {stable_mosaic.version = 11 : i64} {
  func.func @kernel(%arg0: memref<64x16xf32, #tpu.memory_space<vmem>>, %arg1: memref<16x128xf32, #tpu.memory_space<vmem>>, %arg2: memref<32x128xf32, #tpu.memory_space<vmem>>, %arg3: memref<1x128xf32, #tpu.memory_space<vmem>>, %arg4: memref<32x128xf32, #tpu.memory_space<vmem>>, %arg5: memref<32x128xf32, #tpu.memory_space<vmem>>, %arg6: memref<1x128xf32, #tpu.memory_space<vmem>>, %arg7: memref<32x128xf32, #tpu.memory_space<vmem>>, %arg8: memref<1x128xf32, #tpu.memory_space<vmem>>, %arg9: memref<8x128xf32, #tpu.memory_space<vmem>>, %arg10: memref<64x32xf32, #tpu.memory_space<vmem>>, %arg11: memref<64x128xf32, #tpu.memory_space<vmem>>) attributes {dimension_semantics = [], scalar_prefetch = 0 : i64, scratch_operands = 2 : i64, tpu.core_type = #tpu.core_type<tc>} {
    %0 = tpu.iota {dimensions = array<i32: 1>} : vector<8x128xi32>
    %c64_i32 = arith.constant 64 : i32
    %1 = vector.broadcast %c64_i32 : i32 to vector<8x128xi32>
    %2 = arith.cmpi sge, %0, %1 : vector<8x128xi32>
    %c96_i32 = arith.constant 96 : i32
    %3 = vector.broadcast %c96_i32 : i32 to vector<8x128xi32>
    %4 = arith.cmpi slt, %0, %3 : vector<8x128xi32>
    %5 = arith.andi %2, %4 : vector<8x128xi1>
    %c0 = arith.constant 0 : index
    %c0_0 = arith.constant 0 : index
    %6 = vector.load %arg1[%c0, %c0_0] : memref<16x128xf32, #tpu.memory_space<vmem>>, vector<16x128xf32>
    %c0_1 = arith.constant 0 : index
    %c0_2 = arith.constant 0 : index
    %7 = vector.load %arg2[%c0_1, %c0_2] : memref<32x128xf32, #tpu.memory_space<vmem>>, vector<32x128xf32>
    %c0_3 = arith.constant 0 : index
    %c0_4 = arith.constant 0 : index
    %8 = vector.load %arg3[%c0_3, %c0_4] : memref<1x128xf32, #tpu.memory_space<vmem>>, vector<1x128xf32>
    %c0_5 = arith.constant 0 : index
    %c0_6 = arith.constant 0 : index
    %9 = vector.load %arg0[%c0_5, %c0_6] : memref<64x16xf32, #tpu.memory_space<vmem>>, vector<64x16xf32>
    %cst = arith.constant dense<0.000000e+00> : vector<64x128xf32>
    %10 = tpu.matmul %9, %6, %cst {dimension_numbers = #tpu.dot_dimension_numbers<[1], [0], [0], [1], [0, 0, 1, 1], [], []>} : vector<64x16xf32>, vector<16x128xf32>, vector<64x128xf32> -> vector<64x128xf32>
    %11 = vector.broadcast %8 : vector<1x128xf32> to vector<64x128xf32>
    %12 = arith.addf %10, %11 : vector<64x128xf32>
    %c0_7 = arith.constant 0 : index
    %c0_8 = arith.constant 0 : index
    %13 = vector.load %arg11[%c0_7, %c0_8] : memref<64x128xf32, #tpu.memory_space<vmem>>, vector<64x128xf32>
    tpu.vector_store %arg11[%c0_7, %c0_8], %12 {strides = array<i32>} : memref<64x128xf32, #tpu.memory_space<vmem>>, vector<64x128xf32>,
    %cst_9 = arith.constant 0.000000e+00 : f32
    %14 = vector.broadcast %cst_9 : f32 to vector<8x32xf32>
    %cst_10 = arith.constant 0.000000e+00 : f32
    %15 = vector.broadcast %cst_10 : f32 to vector<8x32xf32>
    %c0_i32 = arith.constant 0 : i32
    %c8_i32 = arith.constant 8 : i32
    %16 = arith.muli %c0_i32, %c8_i32 : i32
    %17 = tpu.assume_multiple %16, 8 : i32
    %18 = arith.index_cast %17 : i32 to index
    %c0_11 = arith.constant 0 : index
    %19 = vector.load %arg11[%18, %c0_11] : memref<64x128xf32, #tpu.memory_space<vmem>>, vector<8x128xf32>
    %cst_12 = arith.constant dense<0.000000e+00> : vector<8x128xf32>
    %20 = tpu.matmul %14, %7, %cst_12 {dimension_numbers = #tpu.dot_dimension_numbers<[1], [0], [0], [1], [0, 0, 1, 1], [], []>} : vector<8x32xf32>, vector<32x128xf32>, vector<8x128xf32> -> vector<8x128xf32>
    %21 = arith.addf %19, %20 : vector<8x128xf32>
    %22 = math.tanh %21 : vector<8x128xf32>
    %23 = arith.negf %21 : vector<8x128xf32>
    %24 = math.exp %23 : vector<8x128xf32>
    %cst_13 = arith.constant 1.000000e+00 : f32
    %25 = vector.broadcast %cst_13 : f32 to vector<8x128xf32>
    %26 = arith.addf %25, %24 : vector<8x128xf32>
    %27 = arith.divf %25, %26 : vector<8x128xf32>
    %28 = arith.select %5, %22, %27 : vector<8x128xi1>, vector<8x128xf32>
    %29 = vector.extract_strided_slice %28 {offsets = [0, 0], sizes = [8, 32], strides = [1, 1]} : vector<8x128xf32> to vector<8x32xf32>
    %30 = vector.extract_strided_slice %28 {offsets = [0, 32], sizes = [8, 32], strides = [1, 1]} : vector<8x128xf32> to vector<8x32xf32>
    %31 = vector.extract_strided_slice %28 {offsets = [0, 64], sizes = [8, 32], strides = [1, 1]} : vector<8x128xf32> to vector<8x32xf32>
    %32 = vector.extract_strided_slice %28 {offsets = [0, 96], sizes = [8, 32], strides = [1, 1]} : vector<8x128xf32> to vector<8x32xf32>
    %33 = arith.mulf %30, %15 : vector<8x32xf32>
    %34 = arith.mulf %29, %31 : vector<8x32xf32>
    %35 = arith.addf %33, %34 : vector<8x32xf32>
    %36 = math.tanh %35 : vector<8x32xf32>
    %37 = arith.mulf %32, %36 : vector<8x32xf32>
    %38 = arith.index_cast %17 : i32 to index
    %c0_14 = arith.constant 0 : index
    %39 = vector.load %arg10[%38, %c0_14] : memref<64x32xf32, #tpu.memory_space<vmem>>, vector<8x32xf32>
    tpu.vector_store %arg10[%38, %c0_14], %37 {strides = array<i32>} : memref<64x32xf32, #tpu.memory_space<vmem>>, vector<8x32xf32>,
    %c1_i32 = arith.constant 1 : i32
    %c8_i32_15 = arith.constant 8 : i32
    %40 = arith.muli %c1_i32, %c8_i32_15 : i32
    %41 = tpu.assume_multiple %40, 8 : i32
    %42 = arith.index_cast %41 : i32 to index
    %c0_16 = arith.constant 0 : index
    %43 = vector.load %arg11[%42, %c0_16] : memref<64x128xf32, #tpu.memory_space<vmem>>, vector<8x128xf32>
    %cst_17 = arith.constant dense<0.000000e+00> : vector<8x128xf32>
    %44 = tpu.matmul %37, %7, %cst_17 {dimension_numbers = #tpu.dot_dimension_numbers<[1], [0], [0], [1], [0, 0, 1, 1], [], []>} : vector<8x32xf32>, vector<32x128xf32>, vector<8x128xf32> -> vector<8x128xf32>
    %45 = arith.addf %43, %44 : vector<8x128xf32>
    %46 = math.tanh %45 : vector<8x128xf32>
    %47 = arith.negf %45 : vector<8x128xf32>
    %48 = math.exp %47 : vector<8x128xf32>
    %cst_18 = arith.constant 1.000000e+00 : f32
    %49 = vector.broadcast %cst_18 : f32 to vector<8x128xf32>
    %50 = arith.addf %49, %48 : vector<8x128xf32>
    %51 = arith.divf %49, %50 : vector<8x128xf32>
    %52 = arith.select %5, %46, %51 : vector<8x128xi1>, vector<8x128xf32>
    %53 = vector.extract_strided_slice %52 {offsets = [0, 0], sizes = [8, 32], strides = [1, 1]} : vector<8x128xf32> to vector<8x32xf32>
    %54 = vector.extract_strided_slice %52 {offsets = [0, 32], sizes = [8, 32], strides = [1, 1]} : vector<8x128xf32> to vector<8x32xf32>
    %55 = vector.extract_strided_slice %52 {offsets = [0, 64], sizes = [8, 32], strides = [1, 1]} : vector<8x128xf32> to vector<8x32xf32>
    %56 = vector.extract_strided_slice %52 {offsets = [0, 96], sizes = [8, 32], strides = [1, 1]} : vector<8x128xf32> to vector<8x32xf32>
    %57 = arith.mulf %54, %35 : vector<8x32xf32>
    %58 = arith.mulf %53, %55 : vector<8x32xf32>
    %59 = arith.addf %57, %58 : vector<8x32xf32>
    %60 = math.tanh %59 : vector<8x32xf32>
    %61 = arith.mulf %56, %60 : vector<8x32xf32>
    %62 = arith.index_cast %41 : i32 to index
    %c0_19 = arith.constant 0 : index
    %63 = vector.load %arg10[%62, %c0_19] : memref<64x32xf32, #tpu.memory_space<vmem>>, vector<8x32xf32>
    tpu.vector_store %arg10[%62, %c0_19], %61 {strides = array<i32>} : memref<64x32xf32, #tpu.memory_space<vmem>>, vector<8x32xf32>,
    %c2_i32 = arith.constant 2 : i32
    %c8_i32_20 = arith.constant 8 : i32
    %64 = arith.muli %c2_i32, %c8_i32_20 : i32
    %65 = tpu.assume_multiple %64, 8 : i32
    %66 = arith.index_cast %65 : i32 to index
    %c0_21 = arith.constant 0 : index
    %67 = vector.load %arg11[%66, %c0_21] : memref<64x128xf32, #tpu.memory_space<vmem>>, vector<8x128xf32>
    %cst_22 = arith.constant dense<0.000000e+00> : vector<8x128xf32>
    %68 = tpu.matmul %61, %7, %cst_22 {dimension_numbers = #tpu.dot_dimension_numbers<[1], [0], [0], [1], [0, 0, 1, 1], [], []>} : vector<8x32xf32>, vector<32x128xf32>, vector<8x128xf32> -> vector<8x128xf32>
    %69 = arith.addf %67, %68 : vector<8x128xf32>
    %70 = math.tanh %69 : vector<8x128xf32>
    %71 = arith.negf %69 : vector<8x128xf32>
    %72 = math.exp %71 : vector<8x128xf32>
    %cst_23 = arith.constant 1.000000e+00 : f32
    %73 = vector.broadcast %cst_23 : f32 to vector<8x128xf32>
    %74 = arith.addf %73, %72 : vector<8x128xf32>
    %75 = arith.divf %73, %74 : vector<8x128xf32>
    %76 = arith.select %5, %70, %75 : vector<8x128xi1>, vector<8x128xf32>
    %77 = vector.extract_strided_slice %76 {offsets = [0, 0], sizes = [8, 32], strides = [1, 1]} : vector<8x128xf32> to vector<8x32xf32>
    %78 = vector.extract_strided_slice %76 {offsets = [0, 32], sizes = [8, 32], strides = [1, 1]} : vector<8x128xf32> to vector<8x32xf32>
    %79 = vector.extract_strided_slice %76 {offsets = [0, 64], sizes = [8, 32], strides = [1, 1]} : vector<8x128xf32> to vector<8x32xf32>
    %80 = vector.extract_strided_slice %76 {offsets = [0, 96], sizes = [8, 32], strides = [1, 1]} : vector<8x128xf32> to vector<8x32xf32>
    %81 = arith.mulf %78, %59 : vector<8x32xf32>
    %82 = arith.mulf %77, %79 : vector<8x32xf32>
    %83 = arith.addf %81, %82 : vector<8x32xf32>
    %84 = math.tanh %83 : vector<8x32xf32>
    %85 = arith.mulf %80, %84 : vector<8x32xf32>
    %86 = arith.index_cast %65 : i32 to index
    %c0_24 = arith.constant 0 : index
    %87 = vector.load %arg10[%86, %c0_24] : memref<64x32xf32, #tpu.memory_space<vmem>>, vector<8x32xf32>
    tpu.vector_store %arg10[%86, %c0_24], %85 {strides = array<i32>} : memref<64x32xf32, #tpu.memory_space<vmem>>, vector<8x32xf32>,
    %c3_i32 = arith.constant 3 : i32
    %c8_i32_25 = arith.constant 8 : i32
    %88 = arith.muli %c3_i32, %c8_i32_25 : i32
    %89 = tpu.assume_multiple %88, 8 : i32
    %90 = arith.index_cast %89 : i32 to index
    %c0_26 = arith.constant 0 : index
    %91 = vector.load %arg11[%90, %c0_26] : memref<64x128xf32, #tpu.memory_space<vmem>>, vector<8x128xf32>
    %cst_27 = arith.constant dense<0.000000e+00> : vector<8x128xf32>
    %92 = tpu.matmul %85, %7, %cst_27 {dimension_numbers = #tpu.dot_dimension_numbers<[1], [0], [0], [1], [0, 0, 1, 1], [], []>} : vector<8x32xf32>, vector<32x128xf32>, vector<8x128xf32> -> vector<8x128xf32>
    %93 = arith.addf %91, %92 : vector<8x128xf32>
    %94 = math.tanh %93 : vector<8x128xf32>
    %95 = arith.negf %93 : vector<8x128xf32>
    %96 = math.exp %95 : vector<8x128xf32>
    %cst_28 = arith.constant 1.000000e+00 : f32
    %97 = vector.broadcast %cst_28 : f32 to vector<8x128xf32>
    %98 = arith.addf %97, %96 : vector<8x128xf32>
    %99 = arith.divf %97, %98 : vector<8x128xf32>
    %100 = arith.select %5, %94, %99 : vector<8x128xi1>, vector<8x128xf32>
    %101 = vector.extract_strided_slice %100 {offsets = [0, 0], sizes = [8, 32], strides = [1, 1]} : vector<8x128xf32> to vector<8x32xf32>
    %102 = vector.extract_strided_slice %100 {offsets = [0, 32], sizes = [8, 32], strides = [1, 1]} : vector<8x128xf32> to vector<8x32xf32>
    %103 = vector.extract_strided_slice %100 {offsets = [0, 64], sizes = [8, 32], strides = [1, 1]} : vector<8x128xf32> to vector<8x32xf32>
    %104 = vector.extract_strided_slice %100 {offsets = [0, 96], sizes = [8, 32], strides = [1, 1]} : vector<8x128xf32> to vector<8x32xf32>
    %105 = arith.mulf %102, %83 : vector<8x32xf32>
    %106 = arith.mulf %101, %103 : vector<8x32xf32>
    %107 = arith.addf %105, %106 : vector<8x32xf32>
    %108 = math.tanh %107 : vector<8x32xf32>
    %109 = arith.mulf %104, %108 : vector<8x32xf32>
    %110 = arith.index_cast %89 : i32 to index
    %c0_29 = arith.constant 0 : index
    %111 = vector.load %arg10[%110, %c0_29] : memref<64x32xf32, #tpu.memory_space<vmem>>, vector<8x32xf32>
    tpu.vector_store %arg10[%110, %c0_29], %109 {strides = array<i32>} : memref<64x32xf32, #tpu.memory_space<vmem>>, vector<8x32xf32>,
    %c4_i32 = arith.constant 4 : i32
    %c8_i32_30 = arith.constant 8 : i32
    %112 = arith.muli %c4_i32, %c8_i32_30 : i32
    %113 = tpu.assume_multiple %112, 8 : i32
    %114 = arith.index_cast %113 : i32 to index
    %c0_31 = arith.constant 0 : index
    %115 = vector.load %arg11[%114, %c0_31] : memref<64x128xf32, #tpu.memory_space<vmem>>, vector<8x128xf32>
    %cst_32 = arith.constant dense<0.000000e+00> : vector<8x128xf32>
    %116 = tpu.matmul %109, %7, %cst_32 {dimension_numbers = #tpu.dot_dimension_numbers<[1], [0], [0], [1], [0, 0, 1, 1], [], []>} : vector<8x32xf32>, vector<32x128xf32>, vector<8x128xf32> -> vector<8x128xf32>
    %117 = arith.addf %115, %116 : vector<8x128xf32>
    %118 = math.tanh %117 : vector<8x128xf32>
    %119 = arith.negf %117 : vector<8x128xf32>
    %120 = math.exp %119 : vector<8x128xf32>
    %cst_33 = arith.constant 1.000000e+00 : f32
    %121 = vector.broadcast %cst_33 : f32 to vector<8x128xf32>
    %122 = arith.addf %121, %120 : vector<8x128xf32>
    %123 = arith.divf %121, %122 : vector<8x128xf32>
    %124 = arith.select %5, %118, %123 : vector<8x128xi1>, vector<8x128xf32>
    %125 = vector.extract_strided_slice %124 {offsets = [0, 0], sizes = [8, 32], strides = [1, 1]} : vector<8x128xf32> to vector<8x32xf32>
    %126 = vector.extract_strided_slice %124 {offsets = [0, 32], sizes = [8, 32], strides = [1, 1]} : vector<8x128xf32> to vector<8x32xf32>
    %127 = vector.extract_strided_slice %124 {offsets = [0, 64], sizes = [8, 32], strides = [1, 1]} : vector<8x128xf32> to vector<8x32xf32>
    %128 = vector.extract_strided_slice %124 {offsets = [0, 96], sizes = [8, 32], strides = [1, 1]} : vector<8x128xf32> to vector<8x32xf32>
    %129 = arith.mulf %126, %107 : vector<8x32xf32>
    %130 = arith.mulf %125, %127 : vector<8x32xf32>
    %131 = arith.addf %129, %130 : vector<8x32xf32>
    %132 = math.tanh %131 : vector<8x32xf32>
    %133 = arith.mulf %128, %132 : vector<8x32xf32>
    %134 = arith.index_cast %113 : i32 to index
    %c0_34 = arith.constant 0 : index
    %135 = vector.load %arg10[%134, %c0_34] : memref<64x32xf32, #tpu.memory_space<vmem>>, vector<8x32xf32>
    tpu.vector_store %arg10[%134, %c0_34], %133 {strides = array<i32>} : memref<64x32xf32, #tpu.memory_space<vmem>>, vector<8x32xf32>,
    %c5_i32 = arith.constant 5 : i32
    %c8_i32_35 = arith.constant 8 : i32
    %136 = arith.muli %c5_i32, %c8_i32_35 : i32
    %137 = tpu.assume_multiple %136, 8 : i32
    %138 = arith.index_cast %137 : i32 to index
    %c0_36 = arith.constant 0 : index
    %139 = vector.load %arg11[%138, %c0_36] : memref<64x128xf32, #tpu.memory_space<vmem>>, vector<8x128xf32>
    %cst_37 = arith.constant dense<0.000000e+00> : vector<8x128xf32>
    %140 = tpu.matmul %133, %7, %cst_37 {dimension_numbers = #tpu.dot_dimension_numbers<[1], [0], [0], [1], [0, 0, 1, 1], [], []>} : vector<8x32xf32>, vector<32x128xf32>, vector<8x128xf32> -> vector<8x128xf32>
    %141 = arith.addf %139, %140 : vector<8x128xf32>
    %142 = math.tanh %141 : vector<8x128xf32>
    %143 = arith.negf %141 : vector<8x128xf32>
    %144 = math.exp %143 : vector<8x128xf32>
    %cst_38 = arith.constant 1.000000e+00 : f32
    %145 = vector.broadcast %cst_38 : f32 to vector<8x128xf32>
    %146 = arith.addf %145, %144 : vector<8x128xf32>
    %147 = arith.divf %145, %146 : vector<8x128xf32>
    %148 = arith.select %5, %142, %147 : vector<8x128xi1>, vector<8x128xf32>
    %149 = vector.extract_strided_slice %148 {offsets = [0, 0], sizes = [8, 32], strides = [1, 1]} : vector<8x128xf32> to vector<8x32xf32>
    %150 = vector.extract_strided_slice %148 {offsets = [0, 32], sizes = [8, 32], strides = [1, 1]} : vector<8x128xf32> to vector<8x32xf32>
    %151 = vector.extract_strided_slice %148 {offsets = [0, 64], sizes = [8, 32], strides = [1, 1]} : vector<8x128xf32> to vector<8x32xf32>
    %152 = vector.extract_strided_slice %148 {offsets = [0, 96], sizes = [8, 32], strides = [1, 1]} : vector<8x128xf32> to vector<8x32xf32>
    %153 = arith.mulf %150, %131 : vector<8x32xf32>
    %154 = arith.mulf %149, %151 : vector<8x32xf32>
    %155 = arith.addf %153, %154 : vector<8x32xf32>
    %156 = math.tanh %155 : vector<8x32xf32>
    %157 = arith.mulf %152, %156 : vector<8x32xf32>
    %158 = arith.index_cast %137 : i32 to index
    %c0_39 = arith.constant 0 : index
    %159 = vector.load %arg10[%158, %c0_39] : memref<64x32xf32, #tpu.memory_space<vmem>>, vector<8x32xf32>
    tpu.vector_store %arg10[%158, %c0_39], %157 {strides = array<i32>} : memref<64x32xf32, #tpu.memory_space<vmem>>, vector<8x32xf32>,
    %c6_i32 = arith.constant 6 : i32
    %c8_i32_40 = arith.constant 8 : i32
    %160 = arith.muli %c6_i32, %c8_i32_40 : i32
    %161 = tpu.assume_multiple %160, 8 : i32
    %162 = arith.index_cast %161 : i32 to index
    %c0_41 = arith.constant 0 : index
    %163 = vector.load %arg11[%162, %c0_41] : memref<64x128xf32, #tpu.memory_space<vmem>>, vector<8x128xf32>
    %cst_42 = arith.constant dense<0.000000e+00> : vector<8x128xf32>
    %164 = tpu.matmul %157, %7, %cst_42 {dimension_numbers = #tpu.dot_dimension_numbers<[1], [0], [0], [1], [0, 0, 1, 1], [], []>} : vector<8x32xf32>, vector<32x128xf32>, vector<8x128xf32> -> vector<8x128xf32>
    %165 = arith.addf %163, %164 : vector<8x128xf32>
    %166 = math.tanh %165 : vector<8x128xf32>
    %167 = arith.negf %165 : vector<8x128xf32>
    %168 = math.exp %167 : vector<8x128xf32>
    %cst_43 = arith.constant 1.000000e+00 : f32
    %169 = vector.broadcast %cst_43 : f32 to vector<8x128xf32>
    %170 = arith.addf %169, %168 : vector<8x128xf32>
    %171 = arith.divf %169, %170 : vector<8x128xf32>
    %172 = arith.select %5, %166, %171 : vector<8x128xi1>, vector<8x128xf32>
    %173 = vector.extract_strided_slice %172 {offsets = [0, 0], sizes = [8, 32], strides = [1, 1]} : vector<8x128xf32> to vector<8x32xf32>
    %174 = vector.extract_strided_slice %172 {offsets = [0, 32], sizes = [8, 32], strides = [1, 1]} : vector<8x128xf32> to vector<8x32xf32>
    %175 = vector.extract_strided_slice %172 {offsets = [0, 64], sizes = [8, 32], strides = [1, 1]} : vector<8x128xf32> to vector<8x32xf32>
    %176 = vector.extract_strided_slice %172 {offsets = [0, 96], sizes = [8, 32], strides = [1, 1]} : vector<8x128xf32> to vector<8x32xf32>
    %177 = arith.mulf %174, %155 : vector<8x32xf32>
    %178 = arith.mulf %173, %175 : vector<8x32xf32>
    %179 = arith.addf %177, %178 : vector<8x32xf32>
    %180 = math.tanh %179 : vector<8x32xf32>
    %181 = arith.mulf %176, %180 : vector<8x32xf32>
    %182 = arith.index_cast %161 : i32 to index
    %c0_44 = arith.constant 0 : index
    %183 = vector.load %arg10[%182, %c0_44] : memref<64x32xf32, #tpu.memory_space<vmem>>, vector<8x32xf32>
    tpu.vector_store %arg10[%182, %c0_44], %181 {strides = array<i32>} : memref<64x32xf32, #tpu.memory_space<vmem>>, vector<8x32xf32>,
    %c7_i32 = arith.constant 7 : i32
    %c8_i32_45 = arith.constant 8 : i32
    %184 = arith.muli %c7_i32, %c8_i32_45 : i32
    %185 = tpu.assume_multiple %184, 8 : i32
    %186 = arith.index_cast %185 : i32 to index
    %c0_46 = arith.constant 0 : index
    %187 = vector.load %arg11[%186, %c0_46] : memref<64x128xf32, #tpu.memory_space<vmem>>, vector<8x128xf32>
    %cst_47 = arith.constant dense<0.000000e+00> : vector<8x128xf32>
    %188 = tpu.matmul %181, %7, %cst_47 {dimension_numbers = #tpu.dot_dimension_numbers<[1], [0], [0], [1], [0, 0, 1, 1], [], []>} : vector<8x32xf32>, vector<32x128xf32>, vector<8x128xf32> -> vector<8x128xf32>
    %189 = arith.addf %187, %188 : vector<8x128xf32>
    %190 = math.tanh %189 : vector<8x128xf32>
    %191 = arith.negf %189 : vector<8x128xf32>
    %192 = math.exp %191 : vector<8x128xf32>
    %cst_48 = arith.constant 1.000000e+00 : f32
    %193 = vector.broadcast %cst_48 : f32 to vector<8x128xf32>
    %194 = arith.addf %193, %192 : vector<8x128xf32>
    %195 = arith.divf %193, %194 : vector<8x128xf32>
    %196 = arith.select %5, %190, %195 : vector<8x128xi1>, vector<8x128xf32>
    %197 = vector.extract_strided_slice %196 {offsets = [0, 0], sizes = [8, 32], strides = [1, 1]} : vector<8x128xf32> to vector<8x32xf32>
    %198 = vector.extract_strided_slice %196 {offsets = [0, 32], sizes = [8, 32], strides = [1, 1]} : vector<8x128xf32> to vector<8x32xf32>
    %199 = vector.extract_strided_slice %196 {offsets = [0, 64], sizes = [8, 32], strides = [1, 1]} : vector<8x128xf32> to vector<8x32xf32>
    %200 = vector.extract_strided_slice %196 {offsets = [0, 96], sizes = [8, 32], strides = [1, 1]} : vector<8x128xf32> to vector<8x32xf32>
    %201 = arith.mulf %198, %179 : vector<8x32xf32>
    %202 = arith.mulf %197, %199 : vector<8x32xf32>
    %203 = arith.addf %201, %202 : vector<8x32xf32>
    %204 = math.tanh %203 : vector<8x32xf32>
    %205 = arith.mulf %200, %204 : vector<8x32xf32>
    %206 = arith.index_cast %185 : i32 to index
    %c0_49 = arith.constant 0 : index
    %207 = vector.load %arg10[%206, %c0_49] : memref<64x32xf32, #tpu.memory_space<vmem>>, vector<8x32xf32>
    tpu.vector_store %arg10[%206, %c0_49], %205 {strides = array<i32>} : memref<64x32xf32, #tpu.memory_space<vmem>>, vector<8x32xf32>,
    %c8_i32_50 = arith.constant 8 : i32
    %c0_51 = arith.constant 0 : index
    %c0_52 = arith.constant 0 : index
    %208 = vector.load %arg4[%c0_51, %c0_52] : memref<32x128xf32, #tpu.memory_space<vmem>>, vector<32x128xf32>
    %c0_53 = arith.constant 0 : index
    %c0_54 = arith.constant 0 : index
    %209 = vector.load %arg5[%c0_53, %c0_54] : memref<32x128xf32, #tpu.memory_space<vmem>>, vector<32x128xf32>
    %c0_55 = arith.constant 0 : index
    %c0_56 = arith.constant 0 : index
    %210 = vector.load %arg6[%c0_55, %c0_56] : memref<1x128xf32, #tpu.memory_space<vmem>>, vector<1x128xf32>
    %c0_57 = arith.constant 0 : index
    %c0_58 = arith.constant 0 : index
    %211 = vector.load %arg10[%c0_57, %c0_58] : memref<64x32xf32, #tpu.memory_space<vmem>>, vector<64x32xf32>
    %cst_59 = arith.constant dense<0.000000e+00> : vector<64x128xf32>
    %212 = tpu.matmul %211, %208, %cst_59 {dimension_numbers = #tpu.dot_dimension_numbers<[1], [0], [0], [1], [0, 0, 1, 1], [], []>} : vector<64x32xf32>, vector<32x128xf32>, vector<64x128xf32> -> vector<64x128xf32>
    %213 = vector.broadcast %210 : vector<1x128xf32> to vector<64x128xf32>
    %214 = arith.addf %212, %213 : vector<64x128xf32>
    %c0_60 = arith.constant 0 : index
    %c0_61 = arith.constant 0 : index
    %215 = vector.load %arg11[%c0_60, %c0_61] : memref<64x128xf32, #tpu.memory_space<vmem>>, vector<64x128xf32>
    tpu.vector_store %arg11[%c0_60, %c0_61], %214 {strides = array<i32>} : memref<64x128xf32, #tpu.memory_space<vmem>>, vector<64x128xf32>,
    %cst_62 = arith.constant 0.000000e+00 : f32
    %216 = vector.broadcast %cst_62 : f32 to vector<8x32xf32>
    %cst_63 = arith.constant 0.000000e+00 : f32
    %217 = vector.broadcast %cst_63 : f32 to vector<8x32xf32>
    %c0_i32_64 = arith.constant 0 : i32
    %c8_i32_65 = arith.constant 8 : i32
    %218 = arith.muli %c0_i32_64, %c8_i32_65 : i32
    %219 = tpu.assume_multiple %218, 8 : i32
    %220 = arith.index_cast %219 : i32 to index
    %c0_66 = arith.constant 0 : index
    %221 = vector.load %arg11[%220, %c0_66] : memref<64x128xf32, #tpu.memory_space<vmem>>, vector<8x128xf32>
    %cst_67 = arith.constant dense<0.000000e+00> : vector<8x128xf32>
    %222 = tpu.matmul %216, %209, %cst_67 {dimension_numbers = #tpu.dot_dimension_numbers<[1], [0], [0], [1], [0, 0, 1, 1], [], []>} : vector<8x32xf32>, vector<32x128xf32>, vector<8x128xf32> -> vector<8x128xf32>
    %223 = arith.addf %221, %222 : vector<8x128xf32>
    %224 = math.tanh %223 : vector<8x128xf32>
    %225 = arith.negf %223 : vector<8x128xf32>
    %226 = math.exp %225 : vector<8x128xf32>
    %cst_68 = arith.constant 1.000000e+00 : f32
    %227 = vector.broadcast %cst_68 : f32 to vector<8x128xf32>
    %228 = arith.addf %227, %226 : vector<8x128xf32>
    %229 = arith.divf %227, %228 : vector<8x128xf32>
    %230 = arith.select %5, %224, %229 : vector<8x128xi1>, vector<8x128xf32>
    %231 = vector.extract_strided_slice %230 {offsets = [0, 0], sizes = [8, 32], strides = [1, 1]} : vector<8x128xf32> to vector<8x32xf32>
    %232 = vector.extract_strided_slice %230 {offsets = [0, 32], sizes = [8, 32], strides = [1, 1]} : vector<8x128xf32> to vector<8x32xf32>
    %233 = vector.extract_strided_slice %230 {offsets = [0, 64], sizes = [8, 32], strides = [1, 1]} : vector<8x128xf32> to vector<8x32xf32>
    %234 = vector.extract_strided_slice %230 {offsets = [0, 96], sizes = [8, 32], strides = [1, 1]} : vector<8x128xf32> to vector<8x32xf32>
    %235 = arith.mulf %232, %217 : vector<8x32xf32>
    %236 = arith.mulf %231, %233 : vector<8x32xf32>
    %237 = arith.addf %235, %236 : vector<8x32xf32>
    %238 = math.tanh %237 : vector<8x32xf32>
    %239 = arith.mulf %234, %238 : vector<8x32xf32>
    %c1_i32_69 = arith.constant 1 : i32
    %c8_i32_70 = arith.constant 8 : i32
    %240 = arith.muli %c1_i32_69, %c8_i32_70 : i32
    %241 = tpu.assume_multiple %240, 8 : i32
    %242 = arith.index_cast %241 : i32 to index
    %c0_71 = arith.constant 0 : index
    %243 = vector.load %arg11[%242, %c0_71] : memref<64x128xf32, #tpu.memory_space<vmem>>, vector<8x128xf32>
    %cst_72 = arith.constant dense<0.000000e+00> : vector<8x128xf32>
    %244 = tpu.matmul %239, %209, %cst_72 {dimension_numbers = #tpu.dot_dimension_numbers<[1], [0], [0], [1], [0, 0, 1, 1], [], []>} : vector<8x32xf32>, vector<32x128xf32>, vector<8x128xf32> -> vector<8x128xf32>
    %245 = arith.addf %243, %244 : vector<8x128xf32>
    %246 = math.tanh %245 : vector<8x128xf32>
    %247 = arith.negf %245 : vector<8x128xf32>
    %248 = math.exp %247 : vector<8x128xf32>
    %cst_73 = arith.constant 1.000000e+00 : f32
    %249 = vector.broadcast %cst_73 : f32 to vector<8x128xf32>
    %250 = arith.addf %249, %248 : vector<8x128xf32>
    %251 = arith.divf %249, %250 : vector<8x128xf32>
    %252 = arith.select %5, %246, %251 : vector<8x128xi1>, vector<8x128xf32>
    %253 = vector.extract_strided_slice %252 {offsets = [0, 0], sizes = [8, 32], strides = [1, 1]} : vector<8x128xf32> to vector<8x32xf32>
    %254 = vector.extract_strided_slice %252 {offsets = [0, 32], sizes = [8, 32], strides = [1, 1]} : vector<8x128xf32> to vector<8x32xf32>
    %255 = vector.extract_strided_slice %252 {offsets = [0, 64], sizes = [8, 32], strides = [1, 1]} : vector<8x128xf32> to vector<8x32xf32>
    %256 = vector.extract_strided_slice %252 {offsets = [0, 96], sizes = [8, 32], strides = [1, 1]} : vector<8x128xf32> to vector<8x32xf32>
    %257 = arith.mulf %254, %237 : vector<8x32xf32>
    %258 = arith.mulf %253, %255 : vector<8x32xf32>
    %259 = arith.addf %257, %258 : vector<8x32xf32>
    %260 = math.tanh %259 : vector<8x32xf32>
    %261 = arith.mulf %256, %260 : vector<8x32xf32>
    %c2_i32_74 = arith.constant 2 : i32
    %c8_i32_75 = arith.constant 8 : i32
    %262 = arith.muli %c2_i32_74, %c8_i32_75 : i32
    %263 = tpu.assume_multiple %262, 8 : i32
    %264 = arith.index_cast %263 : i32 to index
    %c0_76 = arith.constant 0 : index
    %265 = vector.load %arg11[%264, %c0_76] : memref<64x128xf32, #tpu.memory_space<vmem>>, vector<8x128xf32>
    %cst_77 = arith.constant dense<0.000000e+00> : vector<8x128xf32>
    %266 = tpu.matmul %261, %209, %cst_77 {dimension_numbers = #tpu.dot_dimension_numbers<[1], [0], [0], [1], [0, 0, 1, 1], [], []>} : vector<8x32xf32>, vector<32x128xf32>, vector<8x128xf32> -> vector<8x128xf32>
    %267 = arith.addf %265, %266 : vector<8x128xf32>
    %268 = math.tanh %267 : vector<8x128xf32>
    %269 = arith.negf %267 : vector<8x128xf32>
    %270 = math.exp %269 : vector<8x128xf32>
    %cst_78 = arith.constant 1.000000e+00 : f32
    %271 = vector.broadcast %cst_78 : f32 to vector<8x128xf32>
    %272 = arith.addf %271, %270 : vector<8x128xf32>
    %273 = arith.divf %271, %272 : vector<8x128xf32>
    %274 = arith.select %5, %268, %273 : vector<8x128xi1>, vector<8x128xf32>
    %275 = vector.extract_strided_slice %274 {offsets = [0, 0], sizes = [8, 32], strides = [1, 1]} : vector<8x128xf32> to vector<8x32xf32>
    %276 = vector.extract_strided_slice %274 {offsets = [0, 32], sizes = [8, 32], strides = [1, 1]} : vector<8x128xf32> to vector<8x32xf32>
    %277 = vector.extract_strided_slice %274 {offsets = [0, 64], sizes = [8, 32], strides = [1, 1]} : vector<8x128xf32> to vector<8x32xf32>
    %278 = vector.extract_strided_slice %274 {offsets = [0, 96], sizes = [8, 32], strides = [1, 1]} : vector<8x128xf32> to vector<8x32xf32>
    %279 = arith.mulf %276, %259 : vector<8x32xf32>
    %280 = arith.mulf %275, %277 : vector<8x32xf32>
    %281 = arith.addf %279, %280 : vector<8x32xf32>
    %282 = math.tanh %281 : vector<8x32xf32>
    %283 = arith.mulf %278, %282 : vector<8x32xf32>
    %c3_i32_79 = arith.constant 3 : i32
    %c8_i32_80 = arith.constant 8 : i32
    %284 = arith.muli %c3_i32_79, %c8_i32_80 : i32
    %285 = tpu.assume_multiple %284, 8 : i32
    %286 = arith.index_cast %285 : i32 to index
    %c0_81 = arith.constant 0 : index
    %287 = vector.load %arg11[%286, %c0_81] : memref<64x128xf32, #tpu.memory_space<vmem>>, vector<8x128xf32>
    %cst_82 = arith.constant dense<0.000000e+00> : vector<8x128xf32>
    %288 = tpu.matmul %283, %209, %cst_82 {dimension_numbers = #tpu.dot_dimension_numbers<[1], [0], [0], [1], [0, 0, 1, 1], [], []>} : vector<8x32xf32>, vector<32x128xf32>, vector<8x128xf32> -> vector<8x128xf32>
    %289 = arith.addf %287, %288 : vector<8x128xf32>
    %290 = math.tanh %289 : vector<8x128xf32>
    %291 = arith.negf %289 : vector<8x128xf32>
    %292 = math.exp %291 : vector<8x128xf32>
    %cst_83 = arith.constant 1.000000e+00 : f32
    %293 = vector.broadcast %cst_83 : f32 to vector<8x128xf32>
    %294 = arith.addf %293, %292 : vector<8x128xf32>
    %295 = arith.divf %293, %294 : vector<8x128xf32>
    %296 = arith.select %5, %290, %295 : vector<8x128xi1>, vector<8x128xf32>
    %297 = vector.extract_strided_slice %296 {offsets = [0, 0], sizes = [8, 32], strides = [1, 1]} : vector<8x128xf32> to vector<8x32xf32>
    %298 = vector.extract_strided_slice %296 {offsets = [0, 32], sizes = [8, 32], strides = [1, 1]} : vector<8x128xf32> to vector<8x32xf32>
    %299 = vector.extract_strided_slice %296 {offsets = [0, 64], sizes = [8, 32], strides = [1, 1]} : vector<8x128xf32> to vector<8x32xf32>
    %300 = vector.extract_strided_slice %296 {offsets = [0, 96], sizes = [8, 32], strides = [1, 1]} : vector<8x128xf32> to vector<8x32xf32>
    %301 = arith.mulf %298, %281 : vector<8x32xf32>
    %302 = arith.mulf %297, %299 : vector<8x32xf32>
    %303 = arith.addf %301, %302 : vector<8x32xf32>
    %304 = math.tanh %303 : vector<8x32xf32>
    %305 = arith.mulf %300, %304 : vector<8x32xf32>
    %c4_i32_84 = arith.constant 4 : i32
    %c8_i32_85 = arith.constant 8 : i32
    %306 = arith.muli %c4_i32_84, %c8_i32_85 : i32
    %307 = tpu.assume_multiple %306, 8 : i32
    %308 = arith.index_cast %307 : i32 to index
    %c0_86 = arith.constant 0 : index
    %309 = vector.load %arg11[%308, %c0_86] : memref<64x128xf32, #tpu.memory_space<vmem>>, vector<8x128xf32>
    %cst_87 = arith.constant dense<0.000000e+00> : vector<8x128xf32>
    %310 = tpu.matmul %305, %209, %cst_87 {dimension_numbers = #tpu.dot_dimension_numbers<[1], [0], [0], [1], [0, 0, 1, 1], [], []>} : vector<8x32xf32>, vector<32x128xf32>, vector<8x128xf32> -> vector<8x128xf32>
    %311 = arith.addf %309, %310 : vector<8x128xf32>
    %312 = math.tanh %311 : vector<8x128xf32>
    %313 = arith.negf %311 : vector<8x128xf32>
    %314 = math.exp %313 : vector<8x128xf32>
    %cst_88 = arith.constant 1.000000e+00 : f32
    %315 = vector.broadcast %cst_88 : f32 to vector<8x128xf32>
    %316 = arith.addf %315, %314 : vector<8x128xf32>
    %317 = arith.divf %315, %316 : vector<8x128xf32>
    %318 = arith.select %5, %312, %317 : vector<8x128xi1>, vector<8x128xf32>
    %319 = vector.extract_strided_slice %318 {offsets = [0, 0], sizes = [8, 32], strides = [1, 1]} : vector<8x128xf32> to vector<8x32xf32>
    %320 = vector.extract_strided_slice %318 {offsets = [0, 32], sizes = [8, 32], strides = [1, 1]} : vector<8x128xf32> to vector<8x32xf32>
    %321 = vector.extract_strided_slice %318 {offsets = [0, 64], sizes = [8, 32], strides = [1, 1]} : vector<8x128xf32> to vector<8x32xf32>
    %322 = vector.extract_strided_slice %318 {offsets = [0, 96], sizes = [8, 32], strides = [1, 1]} : vector<8x128xf32> to vector<8x32xf32>
    %323 = arith.mulf %320, %303 : vector<8x32xf32>
    %324 = arith.mulf %319, %321 : vector<8x32xf32>
    %325 = arith.addf %323, %324 : vector<8x32xf32>
    %326 = math.tanh %325 : vector<8x32xf32>
    %327 = arith.mulf %322, %326 : vector<8x32xf32>
    %c5_i32_89 = arith.constant 5 : i32
    %c8_i32_90 = arith.constant 8 : i32
    %328 = arith.muli %c5_i32_89, %c8_i32_90 : i32
    %329 = tpu.assume_multiple %328, 8 : i32
    %330 = arith.index_cast %329 : i32 to index
    %c0_91 = arith.constant 0 : index
    %331 = vector.load %arg11[%330, %c0_91] : memref<64x128xf32, #tpu.memory_space<vmem>>, vector<8x128xf32>
    %cst_92 = arith.constant dense<0.000000e+00> : vector<8x128xf32>
    %332 = tpu.matmul %327, %209, %cst_92 {dimension_numbers = #tpu.dot_dimension_numbers<[1], [0], [0], [1], [0, 0, 1, 1], [], []>} : vector<8x32xf32>, vector<32x128xf32>, vector<8x128xf32> -> vector<8x128xf32>
    %333 = arith.addf %331, %332 : vector<8x128xf32>
    %334 = math.tanh %333 : vector<8x128xf32>
    %335 = arith.negf %333 : vector<8x128xf32>
    %336 = math.exp %335 : vector<8x128xf32>
    %cst_93 = arith.constant 1.000000e+00 : f32
    %337 = vector.broadcast %cst_93 : f32 to vector<8x128xf32>
    %338 = arith.addf %337, %336 : vector<8x128xf32>
    %339 = arith.divf %337, %338 : vector<8x128xf32>
    %340 = arith.select %5, %334, %339 : vector<8x128xi1>, vector<8x128xf32>
    %341 = vector.extract_strided_slice %340 {offsets = [0, 0], sizes = [8, 32], strides = [1, 1]} : vector<8x128xf32> to vector<8x32xf32>
    %342 = vector.extract_strided_slice %340 {offsets = [0, 32], sizes = [8, 32], strides = [1, 1]} : vector<8x128xf32> to vector<8x32xf32>
    %343 = vector.extract_strided_slice %340 {offsets = [0, 64], sizes = [8, 32], strides = [1, 1]} : vector<8x128xf32> to vector<8x32xf32>
    %344 = vector.extract_strided_slice %340 {offsets = [0, 96], sizes = [8, 32], strides = [1, 1]} : vector<8x128xf32> to vector<8x32xf32>
    %345 = arith.mulf %342, %325 : vector<8x32xf32>
    %346 = arith.mulf %341, %343 : vector<8x32xf32>
    %347 = arith.addf %345, %346 : vector<8x32xf32>
    %348 = math.tanh %347 : vector<8x32xf32>
    %349 = arith.mulf %344, %348 : vector<8x32xf32>
    %c6_i32_94 = arith.constant 6 : i32
    %c8_i32_95 = arith.constant 8 : i32
    %350 = arith.muli %c6_i32_94, %c8_i32_95 : i32
    %351 = tpu.assume_multiple %350, 8 : i32
    %352 = arith.index_cast %351 : i32 to index
    %c0_96 = arith.constant 0 : index
    %353 = vector.load %arg11[%352, %c0_96] : memref<64x128xf32, #tpu.memory_space<vmem>>, vector<8x128xf32>
    %cst_97 = arith.constant dense<0.000000e+00> : vector<8x128xf32>
    %354 = tpu.matmul %349, %209, %cst_97 {dimension_numbers = #tpu.dot_dimension_numbers<[1], [0], [0], [1], [0, 0, 1, 1], [], []>} : vector<8x32xf32>, vector<32x128xf32>, vector<8x128xf32> -> vector<8x128xf32>
    %355 = arith.addf %353, %354 : vector<8x128xf32>
    %356 = math.tanh %355 : vector<8x128xf32>
    %357 = arith.negf %355 : vector<8x128xf32>
    %358 = math.exp %357 : vector<8x128xf32>
    %cst_98 = arith.constant 1.000000e+00 : f32
    %359 = vector.broadcast %cst_98 : f32 to vector<8x128xf32>
    %360 = arith.addf %359, %358 : vector<8x128xf32>
    %361 = arith.divf %359, %360 : vector<8x128xf32>
    %362 = arith.select %5, %356, %361 : vector<8x128xi1>, vector<8x128xf32>
    %363 = vector.extract_strided_slice %362 {offsets = [0, 0], sizes = [8, 32], strides = [1, 1]} : vector<8x128xf32> to vector<8x32xf32>
    %364 = vector.extract_strided_slice %362 {offsets = [0, 32], sizes = [8, 32], strides = [1, 1]} : vector<8x128xf32> to vector<8x32xf32>
    %365 = vector.extract_strided_slice %362 {offsets = [0, 64], sizes = [8, 32], strides = [1, 1]} : vector<8x128xf32> to vector<8x32xf32>
    %366 = vector.extract_strided_slice %362 {offsets = [0, 96], sizes = [8, 32], strides = [1, 1]} : vector<8x128xf32> to vector<8x32xf32>
    %367 = arith.mulf %364, %347 : vector<8x32xf32>
    %368 = arith.mulf %363, %365 : vector<8x32xf32>
    %369 = arith.addf %367, %368 : vector<8x32xf32>
    %370 = math.tanh %369 : vector<8x32xf32>
    %371 = arith.mulf %366, %370 : vector<8x32xf32>
    %c7_i32_99 = arith.constant 7 : i32
    %c8_i32_100 = arith.constant 8 : i32
    %372 = arith.muli %c7_i32_99, %c8_i32_100 : i32
    %373 = tpu.assume_multiple %372, 8 : i32
    %374 = arith.index_cast %373 : i32 to index
    %c0_101 = arith.constant 0 : index
    %375 = vector.load %arg11[%374, %c0_101] : memref<64x128xf32, #tpu.memory_space<vmem>>, vector<8x128xf32>
    %cst_102 = arith.constant dense<0.000000e+00> : vector<8x128xf32>
    %376 = tpu.matmul %371, %209, %cst_102 {dimension_numbers = #tpu.dot_dimension_numbers<[1], [0], [0], [1], [0, 0, 1, 1], [], []>} : vector<8x32xf32>, vector<32x128xf32>, vector<8x128xf32> -> vector<8x128xf32>
    %377 = arith.addf %375, %376 : vector<8x128xf32>
    %378 = math.tanh %377 : vector<8x128xf32>
    %379 = arith.negf %377 : vector<8x128xf32>
    %380 = math.exp %379 : vector<8x128xf32>
    %cst_103 = arith.constant 1.000000e+00 : f32
    %381 = vector.broadcast %cst_103 : f32 to vector<8x128xf32>
    %382 = arith.addf %381, %380 : vector<8x128xf32>
    %383 = arith.divf %381, %382 : vector<8x128xf32>
    %384 = arith.select %5, %378, %383 : vector<8x128xi1>, vector<8x128xf32>
    %385 = vector.extract_strided_slice %384 {offsets = [0, 0], sizes = [8, 32], strides = [1, 1]} : vector<8x128xf32> to vector<8x32xf32>
    %386 = vector.extract_strided_slice %384 {offsets = [0, 32], sizes = [8, 32], strides = [1, 1]} : vector<8x128xf32> to vector<8x32xf32>
    %387 = vector.extract_strided_slice %384 {offsets = [0, 64], sizes = [8, 32], strides = [1, 1]} : vector<8x128xf32> to vector<8x32xf32>
    %388 = vector.extract_strided_slice %384 {offsets = [0, 96], sizes = [8, 32], strides = [1, 1]} : vector<8x128xf32> to vector<8x32xf32>
    %389 = arith.mulf %386, %369 : vector<8x32xf32>
    %390 = arith.mulf %385, %387 : vector<8x32xf32>
    %391 = arith.addf %389, %390 : vector<8x32xf32>
    %392 = math.tanh %391 : vector<8x32xf32>
    %393 = arith.mulf %388, %392 : vector<8x32xf32>
    %c8_i32_104 = arith.constant 8 : i32
    %c0_105 = arith.constant 0 : index
    %c0_106 = arith.constant 0 : index
    %394 = vector.load %arg7[%c0_105, %c0_106] : memref<32x128xf32, #tpu.memory_space<vmem>>, vector<32x128xf32>
    %cst_107 = arith.constant dense<0.000000e+00> : vector<8x128xf32>
    %395 = tpu.matmul %393, %394, %cst_107 {dimension_numbers = #tpu.dot_dimension_numbers<[1], [0], [0], [1], [0, 0, 1, 1], [], []>} : vector<8x32xf32>, vector<32x128xf32>, vector<8x128xf32> -> vector<8x128xf32>
    %c0_108 = arith.constant 0 : index
    %c0_109 = arith.constant 0 : index
    %396 = vector.load %arg8[%c0_108, %c0_109] : memref<1x128xf32, #tpu.memory_space<vmem>>, vector<1x128xf32>
    %397 = vector.broadcast %396 : vector<1x128xf32> to vector<8x128xf32>
    %398 = arith.addf %395, %397 : vector<8x128xf32>
    %c0_110 = arith.constant 0 : index
    %c0_111 = arith.constant 0 : index
    %399 = vector.load %arg9[%c0_110, %c0_111] : memref<8x128xf32, #tpu.memory_space<vmem>>, vector<8x128xf32>
    tpu.vector_store %arg9[%c0_110, %c0_111], %398 {strides = array<i32>} : memref<8x128xf32, #tpu.memory_space<vmem>>, vector<8x128xf32>,
    return
  }
}

</mosaic_0001>

<bundles_post_ra>
// kernel: rnn_classifier_forward.1
= control target key start
LH: loop header
LB: loop body
LE: loop exit
PB: predicated region body
PF: predicated region fallthrough
CT: control target
= control target key end

     0   :  { %vm58_vm0 = vcmask 130048   ;;  %v2733_v0 = vmov 0.0|0.0   ;;  %vm2734_vm1 = vmmov 0   ;;  %v2735_v4 = vmov 0.0   ;;  %s2737_s25 = smov 32   ;;  %s3184_s1 = inlined_call_operand.vmem [shape: f32[16,128], index: 1, kind: input, shape index: {}]   ;;  %s3185_s2 = inlined_call_operand.vmem [shape: f32[32,128], index: 2, kind: input, shape index: {}]   ;;  %s3186_s0 = inlined_call_operand.vmem [shape: f32[64,16], index: 0, kind: input, shape index: {}]   ;;  %s3187_s3 = inlined_call_operand.vmem [shape: f32[1,128], index: 3, kind: input, shape index: {}]   ;;  %s3188_s4 = inlined_call_operand.vmem [shape: f32[32,128], index: 4, kind: input, shape index: {}]   ;;  %s3189_s5 = inlined_call_operand.vmem [shape: f32[32,128], index: 5, kind: input, shape index: {}]   ;;  %s3190_s6 = inlined_call_operand.vmem [shape: f32[1,128], index: 6, kind: input, shape index: {}]   ;;  %s3191_s7 = inlined_call_operand.vmem [shape: f32[32,128], index: 7, kind: input, shape index: {}]   ;;  %s3192_s8 = inlined_call_operand.vmem [shape: f32[1,128], index: 8, kind: input, shape index: {}]   ;;  %s3193_s9 = inlined_call_operand.vmem [shape: f32[8,128], index: 9, kind: output, shape index: {}]  }
   0x1   :  { %2490 = vmatprep.subr.bf16.mxu1 %v2733_v0  ;;  %v37_v1 = vld [vmem:[%s3184_s1] sm:$0xff]  ;;  %v38_v2 = vld [vmem:[%s3184_s1 + $0x8] sm:$0xff]  ;;  %2287 = vmatprep.mubr.msk.f32.mxu1 %vm2734_vm1, %v2735_v4  ;;  %v41_v9 = vld [vmem:[%s3185_s2 + $0x10] sm:$0xff]  ;;  %v32_v22 = vlaneseq  ;;  %vm197_vm5 = vcmask 261120  }
   0x2   :  { %v39_v3 = vld [vmem:[%s3185_s2] sm:$0xff]  ;;  %v2486_v5 = vpack.c.bf16 %v38_v2, %v37_v1  ;;  %v40_v6 = vld [vmem:[%s3185_s2 + $0x8] sm:$0xff]  ;;  %v42_v10 = vld [vmem:[%s3185_s2 + $0x18] sm:$0xff] }
   0x3   :  { %v44_v7 = vld [vmem:[%s3186_s0] sm:$0xff]  ;;  %v2806_v8 = vpack.c.bf16 %v40_v6, %v39_v3  ;;  %v45_v11 = vld [vmem:[%s3186_s0 + $0x8] sm:$0xff]  ;;  %v2819_v12 = vpack.c.bf16 %v42_v10, %v41_v9  ;;  %v33_v24 = vand.u32 127, %v32_v22  ;;  %v46_v53 = vld [vmem:[%s3186_s0 + $0x10] sm:$0xff] }
   0x4   :  { %2267 = vmatprep.mubr.msk.f32.mxu0 %vm58_vm0, %v44_v7  ;;  %2487 = vmatprep.subr.bf16.mxu0 %v2486_v5  ;;  %v2840_v13 = vld [vmem:[%s3187_s3] ss:$0 sm:$0xff]  ;;  %s2736_s3 = smov 64   ;;  %v47_v54 = vld [vmem:[%s3186_s0 + $0x18] sm:$0xff]  ;;  %v49_v56 = vld [vmem:[%s3186_s0 + $0x28] sm:$0xff] }
   0x5   :  { %2492 = vmatpush3.bf16.msra.mxu1 %v2806_v8  ;;  %2489 = vmatpush3.bf16.msra.mxu0 %v2486_v5  ;;  %vm34_vm2 = vcmp.ge.s32.totalorder %v33_v24, 64  ;;  %vm35_vm3 = vcmp.lt.s32.totalorder %v33_v24, 96  ;;  %v48_v55 = vld [vmem:[%s3186_s0 + $0x20] sm:$0xff]  ;;  %v50_v57 = vld [vmem:[%s3186_s0 + $0x30] sm:$0xff]  ;;  %v51_v58 = vld [vmem:[%s3186_s0 + $0x38] sm:$0xff] }
   0x6   :  { %2493 = vmatprep.subr.bf16.mxu1 %v2733_v0  ;;  %2502 = vmatprep.subr.bf16.mxu0 %v2733_v0  ;;  %vm2843_vm4 = vmand %vm34_vm2, %vm35_vm3  ;;  %v2017_v25 = vld [vmem:[%s3191_s7 + $0x10] sm:$0xff] }
   0x8   :  { %2268 = vmatmul.mubr.msk.f32.vlgmr.msra.gmra.mrb[0].mxu0 %vm58_vm0, %v45_v11 }
   0x9   :  { %2495 = vmatpush3.bf16.msra.mxu1 %v2819_v12  ;;  %2504 = vmatpush3.bf16.msra.mxu0 %v2806_v8 }
   0xa   :  { %2496 = vmatprep.subr.bf16.mxu1 %v2733_v0  ;;  %2505 = vmatprep.subr.bf16.mxu0 %v2733_v0 }
   0xb   :  { %2270 = vmatprep.mubr.msk.f32.mxu0 %vm58_vm0, %v46_v53 }
   0xc   :  { %2288 = vmatmul.mubr.f32.vlgmr.msra.gmra.mrb[0].mxu1 %v2735_v4  ;;  %2271 = vmatmul.mubr.msk.f32.gmra.mrb[2].mxu0 %vm58_vm0, %v47_v54 }
   0xd   :  { %2498 = vmatpush3.bf16.msra.mxu1 %v2806_v8  ;;  %2298 = vmatprep.mubr.msk.f32.mxu1 %vm2734_vm1, %v2735_v4 }
   0xe   :  { %2499 = vmatprep.subr.bf16.mxu1 %v2733_v0  ;;  %2507 = vmatpush3.bf16.msra.mxu0 %v2819_v12 }
   0xf   :  { %2514 = vmatprep.subr.bf16.mxu0 %v2733_v0  ;;  %2273 = vmatprep.mubr.msk.f32.mxu0 %vm58_vm0, %v48_v55 }
  0x10   :  { %2274 = vmatmul.mubr.msk.f32.gmra.mrb[4].mxu0 %vm58_vm0, %v49_v56 }
  0x11   :  { %2501 = vmatpush3.bf16.msra.mxu1 %v2819_v12  ;;  %2276 = vmatprep.mubr.msk.f32.mxu0 %vm58_vm0, %v50_v57 }
  0x12   :  { %2508 = vmatprep.subr.bf16.mxu1 %v2733_v0 }
  0x14   :  { %2277 = vmatmul.mubr.msk.f32.gmra.mrb[6].mxu0 %vm58_vm0, %v51_v58 }
  0x15   :  { %2309 = vmatprep.mubr.msk.f32.mxu0 %vm2734_vm1, %v2735_v4 }
  0xdb   :  { %v2269_v14 = vpop.f32.mrb[0].mxu0 }
  0xdc   :  { %v149_v15 = vpop.f32.mrb[1].mxu0  ;;  %v155_v38 = vadd.f32 %v2269_v14, %v2840_v13 }
  0xdd   :  { %v150_v16 = vadd.f32 %v2840_v13, %v149_v15 }
  0xdf   :  { %v267_v17 = vpop.f32.mrb[0].mxu1  ;;  %v2272_v62 = vpop.f32.mrb[2].mxu0 }
  0xe0   :  { %v271_v18 = vadd.f32 %v267_v17, %v150_v16  ;;  %v2289_v19 = vpop.f32.mrb[1].mxu1  ;;  %v159_v63 = vpop.f32.mrb[3].mxu0 }
  0xe1   :  { %v160_v7 = vadd.f32 %v2840_v13, %v159_v63 }
  0xe2   :  { %v2115_v20 = vmul.f32 -1.442695, %v271_v18 }
  0xe3   :  { %v2894_v1 = vpop.f32.mrb[4].mxu0 }
  0xe4   :  { %2605 = vpow2.f32 %v2115_v20  ;;  %v2896_v2 = vpop.f32.mrb[5].mxu0 }
  0xe5   :  { %2607 = vtanh.f32 %v271_v18 }
  0xe7   :  { %v2898_v3 = vpop.f32.mrb[6].mxu0 }
  0xe8   :  { %v2900_v5 = vpop.f32.mrb[7].mxu0 }
  0xee   :  { %v2606_v21 = vpop.eup %2605 }
  0xef   :  { %v276_v23 = vadd.f32 1.0, %v2606_v21  ;;  %v2608_v26 = vpop.eup %2607 }
  0xf1   :  { %2609 = vrcp.f32 %v276_v23 }
  0xfb   :  { %v2610_v27 = vpop.eup %2609 }
  0xfc   :  { %v279_v28 = vsel %vm2843_vm4, %v2608_v26, %v2610_v27 }
  0xfd   :  { %282 = vrot.lane.b32.xlu0 %v279_v28, %s2736_s3  ;;  %v280_v31 = vmul.f32 0.0, %v279_v28 }
 0x16f   :  { %v283_v29 = vpop.permute.xlu0 %282 }
 0x170   :  { %v285_v30 = vmul.f32 %v283_v29, %v279_v28 }
 0x172   :  { %287 = vrot.lane.b32.xlu0 %v285_v30, %s2737_s25  ;;  %v165_v30 = vadd.f32 %v2272_v62, %v2840_v13 }
 0x1e4   :  { %v288_v32 = vpop.permute.xlu0 %287 }
 0x1e5   :  { %v290_v33 = vadd.f32 %v288_v32, %v280_v31 }
 0x1e7   :  { %2611 = vtanh.f32 %v290_v33 }
 0x1f1   :  { %v2612_v34 = vpop.eup %2611 }
 0x1f2   :  { %293 = vrot.lane.b32.xlu1 %v2612_v34, %s2736_s3 }
 0x264   :  { %v294_v35 = vpop.permute.xlu1 %293 }
 0x265   :  { %v296_v36 = vmul.f32 %v294_v35, %v279_v28 }
 0x267   :  { %298 = vrot.lane.b32.xlu1 %v296_v36, %s2737_s25 }
 0x2d9   :  { %v299_v37 = vpop.permute.xlu1 %298 }
 0x2da   :  { %301 = vst.msk [vmem:[#allocation2] sm:$0xff] %vm197_vm5, %v299_v37  ;;  %2299 = vmatmul.mubr.msk.f32.vlgmr.msra.gmra.mrb[2].mxu1 %vm197_vm5, %v299_v37 }
 0x2db   :  { %2510 = vmatpush3.bf16.msra.mxu1 %v2806_v8  ;;  %2320 = vmatprep.mubr.msk.f32.mxu1 %vm2734_vm1, %v2735_v4 }
 0x2dc   :  { %2511 = vmatprep.subr.bf16.mxu1 %v2733_v0 }
 0x2df   :  { %2513 = vmatpush3.bf16.msra.mxu1 %v2819_v12 }
 0x2e0   :  { %2520 = vmatprep.subr.bf16.mxu1 %v2733_v0 }
 0x3ad   :  { %v372_v39 = vpop.f32.mrb[2].mxu1 }
 0x3ae   :  { %v376_v40 = vadd.f32 %v372_v39, %v155_v38  ;;  %v2300_v41 = vpop.f32.mrb[3].mxu1 }
 0x3b0   :  { %v2117_v42 = vmul.f32 -1.442695, %v376_v40 }
 0x3b2   :  { %2613 = vpow2.f32 %v2117_v42 }
 0x3b3   :  { %2615 = vtanh.f32 %v376_v40 }
 0x3bc   :  { %v2614_v43 = vpop.eup %2613 }
 0x3bd   :  { %v381_v44 = vadd.f32 1.0, %v2614_v43  ;;  %v2616_v45 = vpop.eup %2615 }
 0x3bf   :  { %2617 = vrcp.f32 %v381_v44 }
 0x3c9   :  { %v2618_v46 = vpop.eup %2617 }
 0x3ca   :  { %v384_v47 = vsel %vm2843_vm4, %v2616_v45, %v2618_v46 }
 0x3cb   :  { %387 = vrot.lane.b32.xlu0 %v384_v47, %s2736_s3  ;;  %v385_v50 = vmul.f32 %v384_v47, %v290_v33 }
 0x43d   :  { %v388_v48 = vpop.permute.xlu0 %387 }
 0x43e   :  { %v390_v49 = vmul.f32 %v388_v48, %v384_v47 }
 0x440   :  { %392 = vrot.lane.b32.xlu1 %v390_v49, %s2737_s25  ;;  %v170_v49 = vadd.f32 %v2840_v13, %v2896_v2 }
 0x4b2   :  { %v393_v51 = vpop.permute.xlu1 %392 }
 0x4b3   :  { %v395_v52 = vadd.f32 %v393_v51, %v385_v50 }
 0x4b5   :  { %2619 = vtanh.f32 %v395_v52 }
 0x4bf   :  { %v2620_v59 = vpop.eup %2619 }
 0x4c0   :  { %398 = vrot.lane.b32.xlu0 %v2620_v59, %s2736_s3 }
 0x532   :  { %v399_v60 = vpop.permute.xlu0 %398 }
 0x533   :  { %v401_v61 = vmul.f32 %v399_v60, %v384_v47 }
 0x535   :  { %403 = vrot.lane.b32.xlu1 %v401_v61, %s2737_s25 }
 0x5a7   :  { %v404_v6 = vpop.permute.xlu1 %403 }
 0x5a8   :  { %407 = vst.msk [vmem:[#allocation2 + $0x8] sm:$0xff] %vm197_vm5, %v404_v6  ;;  %2310 = vmatmul.mubr.msk.f32.vlgmr.msra.gmra.mrb[8].mxu0 %vm197_vm5, %v404_v6 }
 0x5a9   :  { %2516 = vmatpush3.bf16.msra.mxu0 %v2806_v8  ;;  %2331 = vmatprep.mubr.msk.f32.mxu0 %vm2734_vm1, %v2735_v4 }
 0x5aa   :  { %2517 = vmatprep.subr.bf16.mxu0 %v2733_v0 }
 0x5ad   :  { %2519 = vmatpush3.bf16.msra.mxu0 %v2819_v12 }
 0x5ae   :  { %2526 = vmatprep.subr.bf16.mxu0 %v2733_v0 }
 0x67b   :  { %v478_v9 = vpop.f32.mrb[8].mxu0 }
 0x67c   :  { %v482_v10 = vadd.f32 %v478_v9, %v160_v7  ;;  %v2311_v11 = vpop.f32.mrb[9].mxu0 }
 0x67e   :  { %v2119_v14 = vmul.f32 -1.442695, %v482_v10 }
 0x680   :  { %2621 = vpow2.f32 %v2119_v14 }
 0x681   :  { %2623 = vtanh.f32 %v482_v10  ;;  %v175_v10 = vadd.f32 %v2894_v1, %v2840_v13 }
 0x68a   :  { %v2622_v15 = vpop.eup %2621 }
 0x68b   :  { %v487_v16 = vadd.f32 1.0, %v2622_v15  ;;  %v2624_v17 = vpop.eup %2623 }
 0x68d   :  { %2625 = vrcp.f32 %v487_v16 }
 0x697   :  { %v2626_v18 = vpop.eup %2625 }
 0x698   :  { %v490_v19 = vsel %vm2843_vm4, %v2624_v17, %v2626_v18 }
 0x699   :  { %493 = vrot.lane.b32.xlu0 %v490_v19, %s2736_s3  ;;  %v491_v22 = vmul.f32 %v490_v19, %v395_v52 }
 0x70b   :  { %v494_v20 = vpop.permute.xlu0 %493 }
 0x70c   :  { %v496_v21 = vmul.f32 %v494_v20, %v490_v19 }
 0x70e   :  { %498 = vrot.lane.b32.xlu1 %v496_v21, %s2737_s25 }
 0x780   :  { %v499_v23 = vpop.permute.xlu1 %498 }
 0x781   :  { %v501_v24 = vadd.f32 %v499_v23, %v491_v22 }
 0x783   :  { %2627 = vtanh.f32 %v501_v24 }
 0x78d   :  { %v2628_v26 = vpop.eup %2627 }
 0x78e   :  { %504 = vrot.lane.b32.xlu0 %v2628_v26, %s2736_s3  ;;  %v1045_v26 = vld [vmem:[%s3188_s4 + $0x8] sm:$0xff] }
 0x800   :  { %v505_v27 = vpop.permute.xlu0 %504 }
 0x801   :  { %v507_v28 = vmul.f32 %v505_v27, %v490_v19 }
 0x803   :  { %509 = vrot.lane.b32.xlu1 %v507_v28, %s2737_s25 }
 0x875   :  { %v510_v29 = vpop.permute.xlu1 %509 }
 0x876   :  { %513 = vst.msk [vmem:[#allocation2 + $0x10] sm:$0xff] %vm197_vm5, %v510_v29  ;;  %2321 = vmatmul.mubr.msk.f32.vlgmr.msra.gmra.mrb[4].mxu1 %vm197_vm5, %v510_v29 }
 0x877   :  { %2522 = vmatpush3.bf16.msra.mxu1 %v2806_v8  ;;  %2342 = vmatprep.mubr.msk.f32.mxu1 %vm2734_vm1, %v2735_v4 }
 0x878   :  { %2523 = vmatprep.subr.bf16.mxu1 %v2733_v0 }
 0x87b   :  { %2525 = vmatpush3.bf16.msra.mxu1 %v2819_v12 }
 0x87c   :  { %2532 = vmatprep.subr.bf16.mxu1 %v2733_v0 }
 0x949   :  { %v584_v31 = vpop.f32.mrb[4].mxu1 }
 0x94a   :  { %v588_v32 = vadd.f32 %v584_v31, %v165_v30  ;;  %v2322_v33 = vpop.f32.mrb[5].mxu1  ;;  %v1046_v31 = vld [vmem:[%s3188_s4 + $0x10] sm:$0xff] }
 0x94c   :  { %v2121_v34 = vmul.f32 -1.442695, %v588_v32 }
 0x94e   :  { %2629 = vpow2.f32 %v2121_v34 }
 0x94f   :  { %2631 = vtanh.f32 %v588_v32  ;;  %v1047_v32 = vld [vmem:[%s3188_s4 + $0x18] sm:$0xff] }
 0x950   :  { %v2542_v33 = vpack.c.bf16 %v1047_v32, %v1046_v31 }
 0x958   :  { %v2630_v35 = vpop.eup %2629 }
 0x959   :  { %v593_v36 = vadd.f32 1.0, %v2630_v35  ;;  %v2632_v37 = vpop.eup %2631  ;;  %v1053_v35 = vld [vmem:[#allocation2] sm:$0xff] }
 0x95b   :  { %2633 = vrcp.f32 %v593_v36  ;;  %v1054_v36 = vld [vmem:[#allocation2 + $0x8] sm:$0xff] }
 0x965   :  { %v2634_v38 = vpop.eup %2633 }
 0x966   :  { %v596_v39 = vsel %vm2843_vm4, %v2632_v37, %v2634_v38  ;;  %v1055_v37 = vld [vmem:[#allocation2 + $0x10] sm:$0xff] }
 0x967   :  { %599 = vrot.lane.b32.xlu0 %v596_v39, %s2736_s3  ;;  %v597_v42 = vmul.f32 %v596_v39, %v501_v24  ;;  %v1044_v24 = vld [vmem:[%s3188_s4] sm:$0xff] }
 0x968   :  { %v2538_v27 = vpack.c.bf16 %v1045_v26, %v1044_v24 }
 0x9d9   :  { %v600_v40 = vpop.permute.xlu0 %599 }
 0x9da   :  { %v602_v41 = vmul.f32 %v600_v40, %v596_v39 }
 0x9dc   :  { %604 = vrot.lane.b32.xlu1 %v602_v41, %s2737_s25  ;;  %v180_v41 = vadd.f32 %v2840_v13, %v2900_v5 }
 0xa4e   :  { %v605_v43 = vpop.permute.xlu1 %604 }
 0xa4f   :  { %v607_v44 = vadd.f32 %v605_v43, %v597_v42 }
 0xa51   :  { %2635 = vtanh.f32 %v607_v44 }
 0xa5b   :  { %v2636_v45 = vpop.eup %2635 }
 0xa5c   :  { %610 = vrot.lane.b32.xlu0 %v2636_v45, %s2736_s3 }
 0xace   :  { %v611_v46 = vpop.permute.xlu0 %610 }
 0xacf   :  { %v613_v47 = vmul.f32 %v611_v46, %v596_v39 }
 0xad1   :  { %615 = vrot.lane.b32.xlu1 %v613_v47, %s2737_s25 }
 0xb43   :  { %v616_v48 = vpop.permute.xlu1 %615 }
 0xb44   :  { %619 = vst.msk [vmem:[#allocation2 + $0x18] sm:$0xff] %vm197_vm5, %v616_v48  ;;  %2332 = vmatmul.mubr.msk.f32.vlgmr.msra.gmra.mrb[10].mxu0 %vm197_vm5, %v616_v48 }
 0xb45   :  { %2528 = vmatpush3.bf16.msra.mxu0 %v2806_v8  ;;  %2353 = vmatprep.mubr.msk.f32.mxu0 %vm2734_vm1, %v2735_v4 }
 0xb46   :  { %2529 = vmatprep.subr.bf16.mxu0 %v2733_v0 }
 0xb49   :  { %2531 = vmatpush3.bf16.msra.mxu0 %v2819_v12 }
 0xb4a   :  { %2539 = vmatprep.subr.bf16.mxu0 %v2538_v27 }
 0xb4b   :  { %v1056_v38 = vld [vmem:[#allocation2 + $0x18] sm:$0xff] }
 0xc17   :  { %v690_v50 = vpop.f32.mrb[10].mxu0 }
 0xc18   :  { %v694_v51 = vadd.f32 %v690_v50, %v170_v49  ;;  %v2333_v52 = vpop.f32.mrb[11].mxu0 }
 0xc1a   :  { %v2123_v53 = vmul.f32 -1.442695, %v694_v51 }
 0xc1c   :  { %2637 = vpow2.f32 %v2123_v53 }
 0xc1d   :  { %2639 = vtanh.f32 %v694_v51 }
 0xc26   :  { %v2638_v54 = vpop.eup %2637 }
 0xc27   :  { %v699_v55 = vadd.f32 1.0, %v2638_v54  ;;  %v2640_v56 = vpop.eup %2639 }
 0xc29   :  { %2641 = vrcp.f32 %v699_v55 }
 0xc33   :  { %v2642_v57 = vpop.eup %2641 }
 0xc34   :  { %v702_v58 = vsel %vm2843_vm4, %v2640_v56, %v2642_v57 }
 0xc35   :  { %705 = vrot.lane.b32.xlu0 %v702_v58, %s2736_s3  ;;  %v703_v61 = vmul.f32 %v702_v58, %v607_v44 }
 0xca7   :  { %v706_v59 = vpop.permute.xlu0 %705 }
 0xca8   :  { %v708_v60 = vmul.f32 %v706_v59, %v702_v58 }
 0xcaa   :  { %710 = vrot.lane.b32.xlu1 %v708_v60, %s2737_s25 }
 0xd1c   :  { %v711_v62 = vpop.permute.xlu1 %710 }
 0xd1d   :  { %v713_v63 = vadd.f32 %v711_v62, %v703_v61  ;;  %v1048_v62 = vld [vmem:[%s3189_s5] sm:$0xff] }
 0xd1f   :  { %2643 = vtanh.f32 %v713_v63 }
 0xd29   :  { %v2644_v2 = vpop.eup %2643 }
 0xd2a   :  { %716 = vrot.lane.b32.xlu0 %v2644_v2, %s2736_s3 }
 0xd9c   :  { %v717_v6 = vpop.permute.xlu0 %716 }
 0xd9d   :  { %v719_v7 = vmul.f32 %v717_v6, %v702_v58  ;;  %v1050_v6 = vld [vmem:[%s3189_s5 + $0x10] sm:$0xff] }
 0xd9f   :  { %721 = vrot.lane.b32.xlu1 %v719_v7, %s2737_s25  ;;  %v1051_v7 = vld [vmem:[%s3189_s5 + $0x18] sm:$0xff] }
 0xe11   :  { %v722_v9 = vpop.permute.xlu1 %721 }
 0xe12   :  { %725 = vst.msk [vmem:[#allocation2 + $0x20] sm:$0xff] %vm197_vm5, %v722_v9  ;;  %2343 = vmatmul.mubr.msk.f32.vlgmr.msra.gmra.mrb[6].mxu1 %vm197_vm5, %v722_v9  ;;  %v3020_v9 = vpack.c.bf16 %v1051_v7, %v1050_v6 }
 0xe13   :  { %2534 = vmatpush3.bf16.msra.mxu1 %v2806_v8  ;;  %2364 = vmatprep.mubr.msk.f32.mxu1 %vm2734_vm1, %v2735_v4 }
 0xe14   :  { %2535 = vmatprep.subr.bf16.mxu1 %v2733_v0 }
 0xe17   :  { %2537 = vmatpush3.bf16.msra.mxu1 %v2819_v12 }
 0xe18   :  { %2546 = vmatprep.subr.bf16.mxu1 %v2733_v0 }
 0xe19   :  { %v1057_v39 = vld [vmem:[#allocation2 + $0x20] sm:$0xff] }
 0xee5   :  { %v796_v11 = vpop.f32.mrb[6].mxu1 }
 0xee6   :  { %v800_v14 = vadd.f32 %v796_v11, %v175_v10  ;;  %v2344_v15 = vpop.f32.mrb[7].mxu1 }
 0xee8   :  { %v2125_v16 = vmul.f32 -1.442695, %v800_v14 }
 0xeea   :  { %2645 = vpow2.f32 %v2125_v16  ;;  %v185_v16 = vadd.f32 %v2898_v3, %v2840_v13 }
 0xeeb   :  { %2647 = vtanh.f32 %v800_v14 }
 0xef4   :  { %v2646_v17 = vpop.eup %2645 }
 0xef5   :  { %v805_v18 = vadd.f32 1.0, %v2646_v17  ;;  %v2648_v8 = vpop.eup %2647 }
 0xef7   :  { %2649 = vrcp.f32 %v805_v18 }
 0xf01   :  { %v2650_v19 = vpop.eup %2649 }
 0xf02   :  { %v808_v20 = vsel %vm2843_vm4, %v2648_v8, %v2650_v19  ;;  %v3046_v19 = vld [vmem:[%s3190_s6] ss:$0 sm:$0xff] }
 0xf03   :  { %811 = vrot.lane.b32.xlu0 %v808_v20, %s2736_s3  ;;  %v809_v1 = vmul.f32 %v808_v20, %v713_v63  ;;  %v1049_v63 = vld [vmem:[%s3189_s5 + $0x8] sm:$0xff] }
 0xf04   :  { %v3010_v2 = vpack.c.bf16 %v1049_v63, %v1048_v62 }
 0xf75   :  { %v812_v12 = vpop.permute.xlu0 %811 }
 0xf76   :  { %v814_v21 = vmul.f32 %v812_v12, %v808_v20 }
 0xf78   :  { %816 = vrot.lane.b32.xlu1 %v814_v21, %s2737_s25 }
 0xfea   :  { %v817_v22 = vpop.permute.xlu1 %816 }
 0xfeb   :  { %v819_v23 = vadd.f32 %v817_v22, %v809_v1 }
 0xfed   :  { %2651 = vtanh.f32 %v819_v23 }
 0xff7   :  { %v2652_v28 = vpop.eup %2651 }
 0xff8   :  { %822 = vrot.lane.b32.xlu0 %v2652_v28, %s2736_s3 }
0x106a   :  { %v823_v29 = vpop.permute.xlu0 %822 }
0x106b   :  { %v825_v30 = vmul.f32 %v823_v29, %v808_v20 }
0x106d   :  { %827 = vrot.lane.b32.xlu1 %v825_v30, %s2737_s25 }
0x10df   :  { %v828_v34 = vpop.permute.xlu1 %827 }
0x10e0   :  { %831 = vst.msk [vmem:[#allocation2 + $0x28] sm:$0xff] %vm197_vm5, %v828_v34  ;;  %2354 = vmatmul.mubr.msk.f32.vlgmr.msra.gmra.mrb[12].mxu0 %vm197_vm5, %v828_v34 }
0x10e1   :  { %2541 = vmatpush3.bf16.msra.mxu0 %v2538_v27  ;;  %2375 = vmatprep.mubr.msk.f32.mxu0 %vm197_vm5, %v1053_v35 }
0x10e2   :  { %2543 = vmatprep.subr.bf16.mxu0 %v2542_v33 }
0x10e5   :  { %2545 = vmatpush3.bf16.msra.mxu0 %v2542_v33 }
0x10e6   :  { %2558 = vmatprep.subr.bf16.mxu0 %v2733_v0 }
0x10e7   :  { %v1058_v40 = vld [vmem:[#allocation2 + $0x28] sm:$0xff] }
0x10e8   :  { %2376 = vmatmul.mubr.msk.f32.vlgmr.msra.gmra.mrb[14].mxu0 %vm197_vm5, %v1054_v36 }
0x10e9   :  { %2378 = vmatprep.mubr.msk.f32.mxu0 %vm197_vm5, %v1055_v37  ;;  %2560 = vmatpush3.bf16.msra.mxu0 %v3010_v2 }
0x10ea   :  { %2561 = vmatprep.subr.bf16.mxu0 %v2733_v0 }
0x10ec   :  { %2379 = vmatmul.mubr.msk.f32.gmra.mrb[16].mxu0 %vm197_vm5, %v1056_v38 }
0x10ed   :  { %2381 = vmatprep.mubr.msk.f32.mxu0 %vm197_vm5, %v1057_v39  ;;  %2563 = vmatpush3.bf16.msra.mxu0 %v3020_v9 }
0x10ee   :  { %2570 = vmatprep.subr.bf16.mxu0 %v2733_v0 }
0x10f0   :  { %2382 = vmatmul.mubr.msk.f32.gmra.mrb[18].mxu0 %vm197_vm5, %v1058_v40 }
0x11b3   :  { %v902_v42 = vpop.f32.mrb[12].mxu0 }
0x11b4   :  { %v906_v43 = vadd.f32 %v902_v42, %v180_v41  ;;  %v2355_v44 = vpop.f32.mrb[13].mxu0 }
0x11b6   :  { %v2127_v45 = vmul.f32 -1.442695, %v906_v43 }
0x11b8   :  { %2653 = vpow2.f32 %v2127_v45 }
0x11b9   :  { %2655 = vtanh.f32 %v906_v43 }
0x11bb   :  { %v2986_v46 = vpop.f32.mrb[14].mxu0 }
0x11bc   :  { %v1157_v47 = vpop.f32.mrb[15].mxu0 }
0x11bd   :  { %v1158_v20 = vadd.f32 %v3046_v19, %v1157_v47 }
0x11bf   :  { %v2988_v48 = vpop.f32.mrb[16].mxu0 }
0x11c0   :  { %v2990_v49 = vpop.f32.mrb[17].mxu0 }
0x11c2   :  { %v2654_v50 = vpop.eup %2653 }
0x11c3   :  { %v911_v51 = vadd.f32 1.0, %v2654_v50  ;;  %v2992_v52 = vpop.f32.mrb[18].mxu0  ;;  %v2656_v5 = vpop.eup %2655 }
0x11c4   :  { %v2994_v53 = vpop.f32.mrb[19].mxu0 }
0x11c5   :  { %2657 = vrcp.f32 %v911_v51 }
0x11cf   :  { %v2658_v54 = vpop.eup %2657 }
0x11d0   :  { %v914_v55 = vsel %vm2843_vm4, %v2656_v5, %v2658_v54  ;;  %v1163_v54 = vadd.f32 %v2986_v46, %v3046_v19 }
0x11d1   :  { %917 = vrot.lane.b32.xlu0 %v914_v55, %s2736_s3  ;;  %v915_v58 = vmul.f32 %v914_v55, %v819_v23 }
0x1243   :  { %v918_v56 = vpop.permute.xlu0 %917 }
0x1244   :  { %v920_v57 = vmul.f32 %v918_v56, %v914_v55 }
0x1246   :  { %922 = vrot.lane.b32.xlu1 %v920_v57, %s2737_s25 }
0x12b8   :  { %v923_v59 = vpop.permute.xlu1 %922 }
0x12b9   :  { %v3000_v60 = vadd.f32 %v923_v59, %v915_v58 }
0x12bb   :  { %2659 = vtanh.f32 %v3000_v60 }
0x12c5   :  { %v2660_v61 = vpop.eup %2659 }
0x12c6   :  { %928 = vrot.lane.b32.xlu0 %v2660_v61, %s2736_s3 }
0x1338   :  { %v929_v10 = vpop.permute.xlu0 %928 }
0x1339   :  { %v931_v11 = vmul.f32 %v929_v10, %v914_v55 }
0x133b   :  { %933 = vrot.lane.b32.xlu1 %v931_v11, %s2737_s25 }
0x13ad   :  { %v934_v14 = vpop.permute.xlu1 %933 }
0x13ae   :  { %937 = vst.msk [vmem:[#allocation2 + $0x30] sm:$0xff] %vm197_vm5, %v934_v14  ;;  %2365 = vmatmul.mubr.msk.f32.vlgmr.msra.gmra.mrb[8].mxu1 %vm197_vm5, %v934_v14 }
0x13af   :  { %2548 = vmatpush3.bf16.msra.mxu1 %v3010_v2  ;;  %2395 = vmatprep.mubr.msk.f32.mxu1 %vm2734_vm1, %v2735_v4 }
0x13b0   :  { %2549 = vmatprep.subr.bf16.mxu1 %v2733_v0 }
0x13b3   :  { %2551 = vmatpush3.bf16.msra.mxu1 %v3020_v9 }
0x13b4   :  { %2552 = vmatprep.subr.bf16.mxu1 %v2733_v0 }
0x13b5   :  { %v1059_v15 = vld [vmem:[#allocation2 + $0x30] sm:$0xff] }
0x13b6   :  { %2396 = vmatmul.mubr.f32.vlgmr.msra.gmra.mrb[10].mxu1 %v2735_v4  ;;  %2384 = vmatprep.mubr.msk.f32.mxu0 %vm197_vm5, %v1059_v15 }
0x13b7   :  { %2554 = vmatpush3.bf16.msra.mxu1 %v3010_v2  ;;  %2406 = vmatprep.mubr.msk.f32.mxu1 %vm2734_vm1, %v2735_v4 }
0x13b8   :  { %2555 = vmatprep.subr.bf16.mxu1 %v2733_v0 }
0x13bb   :  { %2557 = vmatpush3.bf16.msra.mxu1 %v3020_v9 }
0x13bc   :  { %2564 = vmatprep.subr.bf16.mxu1 %v2733_v0 }
0x1481   :  { %v1008_v17 = vpop.f32.mrb[8].mxu1 }
0x1482   :  { %v1012_v18 = vadd.f32 %v1008_v17, %v185_v16  ;;  %v2366_v8 = vpop.f32.mrb[9].mxu1 }
0x1484   :  { %v2129_v29 = vmul.f32 -1.442695, %v1012_v18 }
0x1489   :  { %v1271_v12 = vpop.f32.mrb[10].mxu1 }
0x148a   :  { %v1275_v21 = vadd.f32 %v1271_v12, %v1158_v20  ;;  %v2397_v1 = vpop.f32.mrb[11].mxu1 }
0x148c   :  { %v2139_v22 = vmul.f32 -1.442695, %v1275_v21 }
0x148e   :  { %2661 = vpow2.f32 %v2139_v22 }
0x148f   :  { %2663 = vtanh.f32 %v1275_v21  ;;  %v1168_v21 = vadd.f32 %v3046_v19, %v2990_v49 }
0x1498   :  { %v2662_v23 = vpop.eup %2661 }
0x1499   :  { %v1280_v24 = vadd.f32 1.0, %v2662_v23  ;;  %v2664_v13 = vpop.eup %2663 }
0x149b   :  { %2665 = vrcp.f32 %v1280_v24 }
0x149c   :  { %2667 = vpow2.f32 %v2129_v29 }
0x14a5   :  { %v2666_v3 = vpop.eup %2665 }
0x14a6   :  { %v1283_v26 = vsel %vm2843_vm4, %v2664_v13, %v2666_v3  ;;  %v2668_v30 = vpop.eup %2667 }
0x14a7   :  { %1286 = vrot.lane.b32.xlu0 %v1283_v26, %s2736_s3  ;;  %v1284_v31 = vmul.f32 0.0, %v1283_v26  ;;  %v1017_v32 = vadd.f32 1.0, %v2668_v30 }
0x1519   :  { %v1287_v27 = vpop.permute.xlu0 %1286 }
0x151a   :  { %v1289_v28 = vmul.f32 %v1287_v27, %v1283_v26 }
0x151c   :  { %1291 = vrot.lane.b32.xlu1 %v1289_v28, %s2737_s25 }
0x158e   :  { %v1292_v33 = vpop.permute.xlu1 %1291 }
0x158f   :  { %v1294_v34 = vadd.f32 %v1292_v33, %v1284_v31 }
0x1591   :  { %2669 = vtanh.f32 %v1294_v34 }
0x1592   :  { %2671 = vrcp.f32 %v1017_v32 }
0x1593   :  { %2673 = vtanh.f32 %v1012_v18 }
0x159b   :  { %v2670_v35 = vpop.eup %2669 }
0x159c   :  { %v2672_v36 = vpop.eup %2671  ;;  %1297 = vrot.lane.b32.xlu0 %v2670_v35, %s2736_s3 }
0x159d   :  { %v2674_v37 = vpop.eup %2673 }
0x159e   :  { %v1020_v38 = vsel %vm2843_vm4, %v2674_v37, %v2672_v36  ;;  %v1173_v37 = vadd.f32 %v2988_v48, %v3046_v19 }
0x159f   :  { %v1021_v44 = vmul.f32 %v1020_v38, %v3000_v60 }
0x15a0   :  { %1023 = vrot.lane.b32.xlu0 %v1020_v38, %s2736_s3 }
0x160e   :  { %v1298_v39 = vpop.permute.xlu0 %1297 }
0x160f   :  { %v1300_v40 = vmul.f32 %v1298_v39, %v1283_v26 }
0x1611   :  { %1303 = vrot.lane.b32.xlu1 %v1300_v40, %s2737_s25 }
0x1612   :  { %v1024_v41 = vpop.permute.xlu0 %1023 }
0x1613   :  { %v1026_v42 = vmul.f32 %v1024_v41, %v1020_v38 }
0x1615   :  { %1028 = vrot.lane.b32.xlu0 %v1026_v42, %s2737_s25 }
0x1683   :  { %v1304_v43 = vpop.permute.xlu1 %1303 }
0x1684   :  { %2407 = vmatmul.mubr.msk.f32.vlgmr.msra.gmra.mrb[12].mxu1 %vm197_vm5, %v1304_v43 }
0x1685   :  { %2566 = vmatpush3.bf16.msra.mxu1 %v3010_v2  ;;  %2428 = vmatprep.mubr.msk.f32.mxu1 %vm2734_vm1, %v2735_v4 }
0x1686   :  { %2567 = vmatprep.subr.bf16.mxu1 %v2733_v0 }
0x1687   :  { %v1029_v45 = vpop.permute.xlu0 %1028 }
0x1688   :  { %v1031_v47 = vadd.f32 %v1029_v45, %v1021_v44 }
0x1689   :  { %2569 = vmatpush3.bf16.msra.mxu1 %v3020_v9 }
0x168a   :  { %2675 = vtanh.f32 %v1031_v47  ;;  %2576 = vmatprep.subr.bf16.mxu1 %v2733_v0 }
0x1694   :  { %v2676_v50 = vpop.eup %2675 }
0x1695   :  { %1034 = vrot.lane.b32.xlu0 %v2676_v50, %s2736_s3 }
0x1707   :  { %v1035_v51 = vpop.permute.xlu0 %1034 }
0x1708   :  { %v1037_v5 = vmul.f32 %v1035_v51, %v1020_v38 }
0x170a   :  { %1039 = vrot.lane.b32.xlu0 %v1037_v5, %s2737_s25 }
0x1757   :  { %v1373_v55 = vpop.f32.mrb[12].mxu1 }
0x1758   :  { %v1377_v56 = vadd.f32 %v1373_v55, %v1163_v54  ;;  %v2408_v57 = vpop.f32.mrb[13].mxu1 }
0x175a   :  { %v2141_v58 = vmul.f32 -1.442695, %v1377_v56 }
0x175c   :  { %2677 = vpow2.f32 %v2141_v58 }
0x175d   :  { %2679 = vtanh.f32 %v1377_v56 }
0x1766   :  { %v2678_v59 = vpop.eup %2677 }
0x1767   :  { %v1382_v60 = vadd.f32 1.0, %v2678_v59  ;;  %v2680_v61 = vpop.eup %2679  ;;  %v1178_v59 = vadd.f32 %v3046_v19, %v2994_v53 }
0x1769   :  { %2681 = vrcp.f32 %v1382_v60 }
0x1773   :  { %v2682_v62 = vpop.eup %2681 }
0x1774   :  { %v1385_v63 = vsel %vm2843_vm4, %v2680_v61, %v2682_v62 }
0x1775   :  { %1388 = vrot.lane.b32.xlu1 %v1385_v63, %s2736_s3  ;;  %v1386_v15 = vmul.f32 %v1385_v63, %v1294_v34 }
0x177c   :  { %v1040_v6 = vpop.permute.xlu0 %1039 }
0x177d   :  { %1043 = vst.msk [vmem:[#allocation2 + $0x38] sm:$0xff] %vm197_vm5, %v1040_v6 }
0x1784   :  { %v1060_v46 = vld [vmem:[#allocation2 + $0x38] sm:$0xff] }
0x1785   :  { %2385 = vmatmul.mubr.msk.f32.gmra.mrb[20].mxu0 %vm197_vm5, %v1060_v46 }
0x1786   :  { %2417 = vmatprep.mubr.msk.f32.mxu0 %vm2734_vm1, %v2735_v4 }
0x17e7   :  { %v1389_v7 = vpop.permute.xlu1 %1388 }
0x17e8   :  { %v1391_v10 = vmul.f32 %v1389_v7, %v1385_v63 }
0x17ea   :  { %1393 = vrot.lane.b32.xlu1 %v1391_v10, %s2737_s25 }
0x1858   :  { %v3079_v11 = vpop.f32.mrb[20].mxu0 }
0x1859   :  { %v3081_v14 = vpop.f32.mrb[21].mxu0 }
0x185c   :  { %v1394_v16 = vpop.permute.xlu1 %1393 }
0x185d   :  { %v1396_v17 = vadd.f32 %v1394_v16, %v1386_v15 }
0x185f   :  { %2683 = vtanh.f32 %v1396_v17 }
0x1869   :  { %v2684_v18 = vpop.eup %2683 }
0x186a   :  { %1399 = vrot.lane.b32.xlu1 %v2684_v18, %s2736_s3 }
0x18dc   :  { %v1400_v8 = vpop.permute.xlu1 %1399 }
0x18dd   :  { %v1402_v20 = vmul.f32 %v1400_v8, %v1385_v63 }
0x18df   :  { %1405 = vrot.lane.b32.xlu1 %v1402_v20, %s2737_s25 }
0x1951   :  { %v1406_v12 = vpop.permute.xlu1 %1405 }
0x1952   :  { %2418 = vmatmul.mubr.msk.f32.vlgmr.msra.gmra.mrb[22].mxu0 %vm197_vm5, %v1406_v12 }
0x1953   :  { %2572 = vmatpush3.bf16.msra.mxu0 %v3010_v2  ;;  %2439 = vmatprep.mubr.msk.f32.mxu0 %vm2734_vm1, %v2735_v4 }
0x1954   :  { %2573 = vmatprep.subr.bf16.mxu0 %v2733_v0 }
0x1957   :  { %2575 = vmatpush3.bf16.msra.mxu0 %v3020_v9 }
0x1958   :  { %2582 = vmatprep.subr.bf16.mxu0 %v2733_v0 }
0x1a25   :  { %v1475_v1 = vpop.f32.mrb[22].mxu0 }
0x1a26   :  { %v1479_v22 = vadd.f32 %v1475_v1, %v1168_v21  ;;  %v2419_v23 = vpop.f32.mrb[23].mxu0 }
0x1a28   :  { %v2143_v24 = vmul.f32 -1.442695, %v1479_v22 }
0x1a2a   :  { %2685 = vpow2.f32 %v2143_v24 }
0x1a2b   :  { %2687 = vtanh.f32 %v1479_v22  ;;  %v1183_v22 = vadd.f32 %v2992_v52, %v3046_v19 }
0x1a34   :  { %v2686_v13 = vpop.eup %2685 }
0x1a35   :  { %v1484_v3 = vadd.f32 1.0, %v2686_v13  ;;  %v2688_v26 = vpop.eup %2687 }
0x1a37   :  { %2689 = vrcp.f32 %v1484_v3 }
0x1a41   :  { %v2690_v27 = vpop.eup %2689 }
0x1a42   :  { %v1487_v28 = vsel %vm2843_vm4, %v2688_v26, %v2690_v27 }
0x1a43   :  { %1490 = vrot.lane.b32.xlu0 %v1487_v28, %s2736_s3  ;;  %v1488_v49 = vmul.f32 %v1487_v28, %v1396_v17 }
0x1ab5   :  { %v1491_v29 = vpop.permute.xlu0 %1490 }
0x1ab6   :  { %v1493_v30 = vmul.f32 %v1491_v29, %v1487_v28 }
0x1ab8   :  { %1495 = vrot.lane.b32.xlu1 %v1493_v30, %s2737_s25 }
0x1b2a   :  { %v1496_v31 = vpop.permute.xlu1 %1495 }
0x1b2b   :  { %v1498_v32 = vadd.f32 %v1496_v31, %v1488_v49 }
0x1b2d   :  { %2691 = vtanh.f32 %v1498_v32 }
0x1b37   :  { %v2692_v33 = vpop.eup %2691 }
0x1b38   :  { %1501 = vrot.lane.b32.xlu0 %v2692_v33, %s2736_s3 }
0x1baa   :  { %v1502_v34 = vpop.permute.xlu0 %1501 }
0x1bab   :  { %v1504_v35 = vmul.f32 %v1502_v34, %v1487_v28 }
0x1bad   :  { %1507 = vrot.lane.b32.xlu1 %v1504_v35, %s2737_s25 }
0x1c1f   :  { %v1508_v36 = vpop.permute.xlu1 %1507 }
0x1c20   :  { %2429 = vmatmul.mubr.msk.f32.vlgmr.msra.gmra.mrb[14].mxu1 %vm197_vm5, %v1508_v36  ;;  %v1188_v36 = vadd.f32 %v3046_v19, %v3081_v14 }
0x1c21   :  { %2578 = vmatpush3.bf16.msra.mxu1 %v3010_v2  ;;  %2450 = vmatprep.mubr.msk.f32.mxu1 %vm2734_vm1, %v2735_v4 }
0x1c22   :  { %2579 = vmatprep.subr.bf16.mxu1 %v2733_v0 }
0x1c25   :  { %2581 = vmatpush3.bf16.msra.mxu1 %v3020_v9 }
0x1c26   :  { %2588 = vmatprep.subr.bf16.mxu1 %v2733_v0 }
0x1cf3   :  { %v1577_v38 = vpop.f32.mrb[14].mxu1 }
0x1cf4   :  { %v1581_v39 = vadd.f32 %v1577_v38, %v1173_v37  ;;  %v2430_v40 = vpop.f32.mrb[15].mxu1 }
0x1cf6   :  { %v2145_v41 = vmul.f32 -1.442695, %v1581_v39 }
0x1cf8   :  { %2693 = vpow2.f32 %v2145_v41 }
0x1cf9   :  { %2695 = vtanh.f32 %v1581_v39 }
0x1d02   :  { %v2694_v42 = vpop.eup %2693 }
0x1d03   :  { %v1586_v43 = vadd.f32 1.0, %v2694_v42  ;;  %v2696_v44 = vpop.eup %2695 }
0x1d05   :  { %2697 = vrcp.f32 %v1586_v43 }
0x1d0f   :  { %v2698_v45 = vpop.eup %2697 }
0x1d10   :  { %v1589_v47 = vsel %vm2843_vm4, %v2696_v44, %v2698_v45 }
0x1d11   :  { %1592 = vrot.lane.b32.xlu0 %v1589_v47, %s2736_s3  ;;  %v1590_v48 = vmul.f32 %v1589_v47, %v1498_v32 }
0x1d83   :  { %v1593_v50 = vpop.permute.xlu0 %1592 }
0x1d84   :  { %v1595_v51 = vmul.f32 %v1593_v50, %v1589_v47 }
0x1d86   :  { %1597 = vrot.lane.b32.xlu1 %v1595_v51, %s2737_s25 }
0x1df8   :  { %v1598_v5 = vpop.permute.xlu1 %1597 }
0x1df9   :  { %v1600_v54 = vadd.f32 %v1598_v5, %v1590_v48 }
0x1dfb   :  { %2699 = vtanh.f32 %v1600_v54 }
0x1e05   :  { %v2700_v55 = vpop.eup %2699 }
0x1e06   :  { %1603 = vrot.lane.b32.xlu0 %v2700_v55, %s2736_s3 }
0x1e78   :  { %v1604_v56 = vpop.permute.xlu0 %1603 }
0x1e79   :  { %v1606_v57 = vmul.f32 %v1604_v56, %v1589_v47  ;;  %v1193_v56 = vadd.f32 %v3079_v11, %v3046_v19 }
0x1e7b   :  { %1609 = vrot.lane.b32.xlu1 %v1606_v57, %s2737_s25 }
0x1eed   :  { %v1610_v58 = vpop.permute.xlu1 %1609 }
0x1eee   :  { %2440 = vmatmul.mubr.msk.f32.vlgmr.msra.gmra.mrb[24].mxu0 %vm197_vm5, %v1610_v58 }
0x1eef   :  { %2584 = vmatpush3.bf16.msra.mxu0 %v3010_v2  ;;  %2461 = vmatprep.mubr.msk.f32.mxu0 %vm2734_vm1, %v2735_v4 }
0x1ef0   :  { %2585 = vmatprep.subr.bf16.mxu0 %v2733_v0 }
0x1ef3   :  { %2587 = vmatpush3.bf16.msra.mxu0 %v3020_v9 }
0x1ef4   :  { %2594 = vmatprep.subr.bf16.mxu0 %v2733_v0 }
0x1fc1   :  { %v1679_v60 = vpop.f32.mrb[24].mxu0 }
0x1fc2   :  { %v1683_v61 = vadd.f32 %v1679_v60, %v1178_v59  ;;  %v2441_v62 = vpop.f32.mrb[25].mxu0 }
0x1fc4   :  { %v2147_v63 = vmul.f32 -1.442695, %v1683_v61 }
0x1fc6   :  { %2701 = vpow2.f32 %v2147_v63 }
0x1fc7   :  { %2703 = vtanh.f32 %v1683_v61 }
0x1fd0   :  { %v2702_v6 = vpop.eup %2701 }
0x1fd1   :  { %v1688_v46 = vadd.f32 1.0, %v2702_v6  ;;  %v2704_v7 = vpop.eup %2703 }
0x1fd3   :  { %2705 = vrcp.f32 %v1688_v46 }
0x1fdd   :  { %v2706_v10 = vpop.eup %2705 }
0x1fde   :  { %v1691_v15 = vsel %vm2843_vm4, %v2704_v7, %v2706_v10 }
0x1fdf   :  { %1694 = vrot.lane.b32.xlu0 %v1691_v15, %s2736_s3  ;;  %v1692_v53 = vmul.f32 %v1691_v15, %v1600_v54 }
0x2051   :  { %v1695_v16 = vpop.permute.xlu0 %1694 }
0x2052   :  { %v1697_v17 = vmul.f32 %v1695_v16, %v1691_v15  ;;  %v2015_v16 = vld [vmem:[%s3191_s7] sm:$0xff] }
0x2054   :  { %1699 = vrot.lane.b32.xlu1 %v1697_v17, %s2737_s25  ;;  %v2016_v17 = vld [vmem:[%s3191_s7 + $0x8] sm:$0xff] }
0x20c6   :  { %v1700_v18 = vpop.permute.xlu1 %1699 }
0x20c7   :  { %v1702_v8 = vadd.f32 %v1700_v18, %v1692_v53  ;;  %v2595_v53 = vpack.c.bf16 %v2016_v17, %v2015_v16  ;;  %v2018_v18 = vld [vmem:[%s3191_s7 + $0x18] sm:$0xff] }
0x20c9   :  { %2707 = vtanh.f32 %v1702_v8 }
0x20d3   :  { %v2708_v20 = vpop.eup %2707 }
0x20d4   :  { %1705 = vrot.lane.b32.xlu0 %v2708_v20, %s2736_s3 }
0x2146   :  { %v1706_v12 = vpop.permute.xlu0 %1705 }
0x2147   :  { %v1708_v21 = vmul.f32 %v1706_v12, %v1691_v15 }
0x2149   :  { %1711 = vrot.lane.b32.xlu1 %v1708_v21, %s2737_s25 }
0x21bb   :  { %v1712_v1 = vpop.permute.xlu1 %1711 }
0x21bc   :  { %2451 = vmatmul.mubr.msk.f32.vlgmr.msra.gmra.mrb[16].mxu1 %vm197_vm5, %v1712_v1 }
0x21bd   :  { %2590 = vmatpush3.bf16.msra.mxu1 %v3010_v2  ;;  %2472 = vmatprep.mubr.msk.f32.mxu1 %vm2734_vm1, %v2735_v4 }
0x21be   :  { %2591 = vmatprep.subr.bf16.mxu1 %v2733_v0 }
0x21c1   :  { %2593 = vmatpush3.bf16.msra.mxu1 %v3020_v9 }
0x228f   :  { %v1781_v23 = vpop.f32.mrb[16].mxu1 }
0x2290   :  { %v1785_v24 = vadd.f32 %v1781_v23, %v1183_v22  ;;  %v2452_v13 = vpop.f32.mrb[17].mxu1  ;;  %v2154_v22 = vld [vmem:[%s3192_s8] ss:$0 sm:$0xff] }
0x2292   :  { %v2149_v3 = vmul.f32 -1.442695, %v1785_v24 }
0x2294   :  { %2709 = vpow2.f32 %v2149_v3 }
0x2295   :  { %2711 = vtanh.f32 %v1785_v24 }
0x229e   :  { %v2710_v26 = vpop.eup %2709 }
0x229f   :  { %v1790_v27 = vadd.f32 1.0, %v2710_v26  ;;  %v2712_v2 = vpop.eup %2711 }
0x22a1   :  { %2713 = vrcp.f32 %v1790_v27 }
0x22ab   :  { %v2714_v28 = vpop.eup %2713 }
0x22ac   :  { %v1793_v29 = vsel %vm2843_vm4, %v2712_v2, %v2714_v28 }
0x22ad   :  { %1796 = vrot.lane.b32.xlu0 %v1793_v29, %s2736_s3  ;;  %v1794_v52 = vmul.f32 %v1793_v29, %v1702_v8  ;;  %v2598_v8 = vpack.c.bf16 %v2018_v18, %v2017_v25 }
0x231f   :  { %v1797_v9 = vpop.permute.xlu0 %1796 }
0x2320   :  { %v1799_v30 = vmul.f32 %v1797_v9, %v1793_v29 }
0x2322   :  { %1801 = vrot.lane.b32.xlu1 %v1799_v30, %s2737_s25 }
0x2394   :  { %v1802_v49 = vpop.permute.xlu1 %1801 }
0x2395   :  { %v1804_v31 = vadd.f32 %v1802_v49, %v1794_v52 }
0x2397   :  { %2715 = vtanh.f32 %v1804_v31 }
0x23a1   :  { %v2716_v32 = vpop.eup %2715 }
0x23a2   :  { %1807 = vrot.lane.b32.xlu0 %v2716_v32, %s2736_s3 }
0x2414   :  { %v1808_v33 = vpop.permute.xlu0 %1807 }
0x2415   :  { %v1810_v34 = vmul.f32 %v1808_v33, %v1793_v29 }
0x2417   :  { %1813 = vrot.lane.b32.xlu1 %v1810_v34, %s2737_s25 }
0x2489   :  { %v1814_v35 = vpop.permute.xlu1 %1813 }
0x248a   :  { %2462 = vmatmul.mubr.msk.f32.vlgmr.msra.gmra.mrb[26].mxu0 %vm197_vm5, %v1814_v35 }
0x248b   :  { %2483 = vmatprep.mubr.msk.f32.mxu0 %vm2734_vm1, %v2735_v4  ;;  %2596 = vmatpush3.bf16.msra.mxu0 %v2595_v53 }
0x248c   :  { %2597 = vmatprep.subr.bf16.mxu0 %v2733_v0 }
0x248f   :  { %2599 = vmatpush3.bf16.msra.mxu0 %v2598_v8 }
0x255d   :  { %v1883_v37 = vpop.f32.mrb[26].mxu0 }
0x255e   :  { %v1887_v38 = vadd.f32 %v1883_v37, %v1188_v36  ;;  %v2463_v39 = vpop.f32.mrb[27].mxu0 }
0x2560   :  { %v2151_v40 = vmul.f32 -1.442695, %v1887_v38 }
0x2562   :  { %2717 = vpow2.f32 %v2151_v40 }
0x2563   :  { %2719 = vtanh.f32 %v1887_v38 }
0x256c   :  { %v2718_v41 = vpop.eup %2717 }
0x256d   :  { %v1892_v42 = vadd.f32 1.0, %v2718_v41  ;;  %v2720_v43 = vpop.eup %2719 }
0x256f   :  { %2721 = vrcp.f32 %v1892_v42 }
0x2579   :  { %v2722_v44 = vpop.eup %2721 }
0x257a   :  { %v1895_v45 = vsel %vm2843_vm4, %v2720_v43, %v2722_v44 }
0x257b   :  { %1898 = vrot.lane.b32.xlu0 %v1895_v45, %s2736_s3  ;;  %v1896_v14 = vmul.f32 %v1895_v45, %v1804_v31 }
0x25ed   :  { %v1899_v4 = vpop.permute.xlu0 %1898 }
0x25ee   :  { %v1901_v47 = vmul.f32 %v1899_v4, %v1895_v45 }
0x25f0   :  { %1903 = vrot.lane.b32.xlu1 %v1901_v47, %s2737_s25 }
0x2662   :  { %v1904_v50 = vpop.permute.xlu1 %1903 }
0x2663   :  { %v1906_v51 = vadd.f32 %v1904_v50, %v1896_v14 }
0x2665   :  { %2723 = vtanh.f32 %v1906_v51 }
0x266f   :  { %v2724_v48 = vpop.eup %2723 }
0x2670   :  { %1909 = vrot.lane.b32.xlu0 %v2724_v48, %s2736_s3 }
0x26e2   :  { %v1910_v5 = vpop.permute.xlu0 %1909 }
0x26e3   :  { %v1912_v54 = vmul.f32 %v1910_v5, %v1895_v45 }
0x26e5   :  { %1915 = vrot.lane.b32.xlu1 %v1912_v54, %s2737_s25 }
0x2757   :  { %v1916_v55 = vpop.permute.xlu1 %1915 }
0x2758   :  { %2473 = vmatmul.mubr.msk.f32.vlgmr.msra.gmra.mrb[18].mxu1 %vm197_vm5, %v1916_v55 }
0x282b   :  { %v1985_v57 = vpop.f32.mrb[18].mxu1 }
0x282c   :  { %v1989_v58 = vadd.f32 %v1985_v57, %v1193_v56  ;;  %v2474_v59 = vpop.f32.mrb[19].mxu1 }
0x282e   :  { %v2153_v60 = vmul.f32 -1.442695, %v1989_v58 }
0x2830   :  { %2725 = vpow2.f32 %v2153_v60 }
0x2831   :  { %2727 = vtanh.f32 %v1989_v58 }
0x283a   :  { %v2726_v61 = vpop.eup %2725 }
0x283b   :  { %v1994_v62 = vadd.f32 1.0, %v2726_v61  ;;  %v2728_v63 = vpop.eup %2727 }
0x283d   :  { %2729 = vrcp.f32 %v1994_v62 }
0x2847   :  { %v2730_v6 = vpop.eup %2729 }
0x2848   :  { %v1997_v46 = vsel %vm2843_vm4, %v2728_v63, %v2730_v6 }
0x2849   :  { %2000 = vrot.lane.b32.xlu0 %v1997_v46, %s2736_s3  ;;  %v1998_v19 = vmul.f32 %v1997_v46, %v1906_v51 }
0x28bb   :  { %v2001_v7 = vpop.permute.xlu0 %2000 }
0x28bc   :  { %v2003_v10 = vmul.f32 %v2001_v7, %v1997_v46 }
0x28be   :  { %2005 = vrot.lane.b32.xlu1 %v2003_v10, %s2737_s25 }
0x2930   :  { %v2006_v11 = vpop.permute.xlu1 %2005 }
0x2931   :  { %v2008_v15 = vadd.f32 %v2006_v11, %v1998_v19 }
0x2933   :  { %2731 = vtanh.f32 %v2008_v15 }
0x293d   :  { %v2732_v20 = vpop.eup %2731 }
0x293e   :  { %2011 = vrot.lane.b32.xlu0 %v2732_v20, %s2736_s3 }
0x29b0   :  { %v2012_v12 = vpop.permute.xlu0 %2011 }
0x29b1   :  { %v2014_v21 = vmul.f32 %v2012_v12, %v1997_v46 }
0x29b3   :  { %2027 = vrot.lane.b32.xlu1 %v2014_v21, %s2737_s25 }
0x2a25   :  { %v2028_v1 = vpop.permute.xlu1 %2027 }
0x2a26   :  { %2484 = vmatmul.mubr.msk.f32.vlgmr.msra.gmra.mrb[28].mxu0 %vm197_vm5, %v2028_v1 }
0x2af9   :  { %v2097_v23 = vpop.f32.mrb[28].mxu0 }
0x2afa   :  { %v2098_v24 = vadd.f32 %v2154_v22, %v2097_v23  ;;  %v2485_v13 = vpop.f32.mrb[29].mxu0 }
0x2afc   :  { %2101 = vst [vmem:[%s3193_s9] sm:$0xff] %v2098_v24 }

</bundles_post_ra>
